<compile_context>
chip_gen: v7x
topology: tpu7x:2x2x1
jax: 0.10.0
libtpu: 0.0.40
codegen_flags: <defaults>
</compile_context>

<pallas_src>
import numpy as np
import jax
import jax.numpy as jnp
from jax.experimental import pallas as pl
from jax.experimental.pallas import tpu as pltpu


# ----------------------------- fused Pallas kernel -----------------------------

def _make_lenet_kernel(num_fc_terms: int):
    f32 = jnp.float32

    def kernel(x_ref, g1_ref, psel_ref, b1_ref, s1w_ref, s1h_ref,
               g2_ref, qsel_ref, b2_ref, s2w_ref, s2h_ref,
               afc_ref, wfc_ref, bfc_ref, out_ref):
        def dot(a, b):
            return jnp.dot(a, b, preferred_element_type=f32)

        x2d = x_ref[...]                                        # (16B, 16)

        # conv1: 5 banded matmuls (one per kernel row) + row-combine selectors.
        acc1 = dot(psel_ref[0], dot(x2d, g1_ref[0]))
        for i in range(1, 5):
            acc1 = acc1 + dot(psel_ref[i], dot(x2d, g1_ref[i]))
        out1 = acc1 + b1_ref[...]                               # (12B, 120) lanes=(wo,co)

        # mxpl1 (2x2) + relu1 via selection matmuls (lane pairs, then row pairs).
        mw = jnp.maximum(dot(out1, s1w_ref[0]), dot(out1, s1w_ref[1]))   # (12B, 60)
        mh = jnp.maximum(dot(s1h_ref[0], mw), dot(s1h_ref[1], mw))       # (6B, 60)
        p1 = jnp.maximum(mh, 0.0)                               # pooled1, lanes=(w, ci)

        # conv2: same banded-matmul structure (contracts (j, cin) per kernel row).
        acc2 = dot(qsel_ref[0], dot(p1, g2_ref[0]))
        for i in range(1, 5):
            acc2 = acc2 + dot(qsel_ref[i], dot(p1, g2_ref[i]))
        out2 = acc2 + b2_ref[...]                               # (2B, 40) lanes=(wo,co)

        # mxol2 (2x2) + relu2  ->  (B, 20)
        m2w = jnp.maximum(dot(out2, s2w_ref[0]), dot(out2, s2w_ref[1]))  # (2B, 20)
        m2 = jnp.maximum(dot(s2h_ref[0], m2w), dot(s2h_ref[1], m2w))     # (B, 20)
        p2 = jnp.maximum(m2, 0.0)                               # covers relu2 + post-flatten relu
        # drop1 / F.dropout: identity (inference).
        # TODO(synk): training-mode dropout not implemented.

        # Flatten(50) + fc2: the x.view(-1, 50) re-chunking is folded into
        # per-(sample, output-row) weight matrices -> sum of small matmuls.
        acc = dot(dot(afc_ref[0], p2), wfc_ref[0])
        for t in range(1, num_fc_terms):
            acc = acc + dot(dot(afc_ref[t], p2), wfc_ref[t])
        logits = acc + bfc_ref[...]                             # (R, 10)

        # log_softmax (dim=1), numerically stable.
        m = jnp.max(logits, axis=-1, keepdims=True)
        s = logits - m
        lse = jnp.log(jnp.sum(jnp.exp(s), axis=-1, keepdims=True))
        out_ref[...] = s - lse

    return kernel


# ------------------------ constant selection/band matrices ------------------------

def _build_selectors(B: int):
    """0/1 constant matrices (numpy, trace-time constants)."""
    eyeB = np.eye(B, dtype=np.float32)

    # conv1 row-combine: psel[i] @ Y picks row h = ho + i within each sample.
    psel = np.zeros((5, 12 * B, 16 * B), np.float32)
    for i in range(5):
        s = np.zeros((12, 16), np.float32)
        s[np.arange(12), np.arange(12) + i] = 1.0
        psel[i] = np.kron(eyeB, s)

    # pool1 lane selectors (lanes = wo*10 + co): pick even / odd wo.
    s1w = np.zeros((2, 120, 60), np.float32)
    for k in range(2):
        sel = np.zeros((12, 6), np.float32)
        sel[np.arange(k, 12, 2), np.arange(6)] = 1.0
        s1w[k] = np.kron(sel, np.eye(10, dtype=np.float32))

    # pool1 row selectors: pick even / odd ho.
    s1h = np.zeros((2, 6 * B, 12 * B), np.float32)
    for k in range(2):
        sel = np.zeros((6, 12), np.float32)
        sel[np.arange(6), np.arange(k, 12, 2)] = 1.0
        s1h[k] = np.kron(eyeB, sel)

    # conv2 row-combine: qsel[i] picks row h = ho + i within each sample.
    qsel = np.zeros((5, 2 * B, 6 * B), np.float32)
    for i in range(5):
        t = np.zeros((2, 6), np.float32)
        t[np.arange(2), np.arange(2) + i] = 1.0
        qsel[i] = np.kron(eyeB, t)

    # pool2 lane selectors (lanes = wo*20 + co) and row selectors (rows = b*2 + ho).
    s2w = np.stack([np.kron(np.array([[1.0], [0.0]], np.float32), np.eye(20, dtype=np.float32)),
                    np.kron(np.array([[0.0], [1.0]], np.float32), np.eye(20, dtype=np.float32))])
    s2h = np.stack([np.kron(eyeB, np.array([[1.0, 0.0]], np.float32)),
                    np.kron(eyeB, np.array([[0.0, 1.0]], np.float32))])

    # Band masks: band[j, w, wo] = 1 iff w == wo + j.
    band1 = np.zeros((5, 16, 12), np.float32)
    band2 = np.zeros((5, 6, 2), np.float32)
    for j in range(5):
        band1[j, np.arange(12) + j, np.arange(12)] = 1.0
        band2[j, np.arange(2) + j, np.arange(2)] = 1.0

    # Flatten(50)+fc2 folding: flat row r, column c maps to sample b = (50r+c)//20,
    # channel co = (50r+c) % 20.  One (placement, weight-selection) pair per active
    # (sample, output-row) combination.
    R = (B * 20) // 50
    a_terms, m_terms = [], []
    for b in range(B):
        for r in range(R):
            cols = 20 * b + np.arange(20) - 50 * r
            valid = (cols >= 0) & (cols < 50)
            if not valid.any():
                continue
            a = np.zeros((R, B), np.float32)
            a[r, b] = 1.0
            msel = np.zeros((20, 50), np.float32)
            msel[np.arange(20)[valid], cols[valid]] = 1.0
            a_terms.append(a)
            m_terms.append(msel)
    afc = np.stack(a_terms)          # (T, R, B)
    msel = np.stack(m_terms)         # (T, 20, 50)

    return psel, s1w, s1h, qsel, s2w, s2h, band1, band2, afc, msel


def _full_vmem_spec(shape):
    if len(shape) == 2:
        return pl.BlockSpec(shape, lambda i: (0, 0))
    if len(shape) == 3:
        return pl.BlockSpec(shape, lambda i: (0, 0, 0))
    raise ValueError(f"unexpected rank: {shape}")


# ----------------------------- forward (single pallas_call) -----------------------------

def lenet_forward(x, params):
    B = x.shape[0]
    assert x.shape[1:] == (1, 16, 16), x.shape
    assert (B * 20) % 50 == 0, "Flatten(50) requires batch to be a multiple of 5"
    R = (B * 20) // 50

    (psel, s1w, s1h, qsel, s2w, s2h, band1, band2, afc, msel) = _build_selectors(B)

    # Weight preprocessing (weights path only; tiny, no activation-path glue).
    w1 = params["conv1_w"].astype(jnp.float32)          # (10, 1, 5, 5)
    w2 = params["conv2_w"].astype(jnp.float32)          # (20, 10, 5, 5)
    # g1[i, w, wo*10+co] = w1[co, 0, i, w-wo]   (banded over w-wo in [0,5))
    g1 = jnp.einsum("jwv,cij->iwvc", band1, w1[:, 0]).reshape(5, 16, 120)
    # g2[i, w*10+ci, wo*20+co] = w2[co, ci, i, w-wo]
    g2 = jnp.einsum("jwv,ocij->iwcvo", band2, w2).reshape(5, 60, 40)
    b1row = jnp.tile(params["conv1_b"].astype(jnp.float32), 12).reshape(1, 120)
    b2row = jnp.tile(params["conv2_b"].astype(jnp.float32), 2).reshape(1, 40)
    # wfc_terms[t, co, n] = fc2_w[n, col(t, co)] (0 where out of this term's window)
    wfc_terms = jnp.einsum("tcf,nf->tcn", msel, params["fc2_w"].astype(jnp.float32))
    bfc_row = params["fc2_b"].astype(jnp.float32).reshape(1, 10)

    x2d = x.astype(jnp.float32).reshape(B * 16, 16)      # rows = b*16 + h, lanes = w

    inputs = [x2d, g1, psel, b1row, s1w, s1h,
              g2, qsel, b2row, s2w, s2h,
              afc, wfc_terms, bfc_row]
    in_specs = [_full_vmem_spec(tuple(a.shape)) for a in inputs]

    kernel = _make_lenet_kernel(num_fc_terms=int(afc.shape[0]))

    return pl.pallas_call(
        kernel,
        out_shape=jax.ShapeDtypeStruct((R, 10), jnp.float32),
        grid=(1,),
        in_specs=in_specs,
        out_specs=pl.BlockSpec((R, 10), lambda i: (0, 0)),
        compiler_params=pltpu.CompilerParams(dimension_semantics=("arbitrary",)),
        cost_estimate=pl.CostEstimate(
            flops=int(2_200_000 * B), transcendentals=16 * R, bytes_accessed=300_000),
    )(*inputs)


# ----------------------------- pure-JAX reference (for checking) -----------------------------

def _reference_forward(x, params):
    hi = jax.lax.Precision.HIGHEST

    def conv2d(inp, w, b):
        Bn, Cin, H, W = inp.shape
        Cout, _, k, _ = w.shape
        Ho, Wo = H - k + 1, W - k + 1
        out = jnp.zeros((Bn, Cout, Ho, Wo), jnp.float32)
        for i in range(k):
            for j in range(k):
                patch = inp[:, :, i:i + Ho, j:j + Wo]
                out = out + jnp.einsum("bchw,oc->bohw", patch, w[:, :, i, j], precision=hi)
        return out + b[None, :, None, None]

    def maxpool2(inp):
        Bn, C, H, W = inp.shape
        return jnp.max(inp.reshape(Bn, C, H // 2, 2, W // 2, 2), axis=(3, 5))

    y = conv2d(x.astype(jnp.float32), params["conv1_w"], params["conv1_b"])
    y = jax.nn.relu(maxpool2(y))
    y = conv2d(y, params["conv2_w"], params["conv2_b"])
    y = jax.nn.relu(maxpool2(y))
    feat = jax.nn.relu(y.reshape(-1, 50))
    logits = jnp.dot(feat, params["fc2_w"].T, precision=hi) + params["fc2_b"]
    return jax.nn.log_softmax(logits, axis=-1)


# ----------------------------------- main -----------------------------------

if __name__ == "__main__":
    key = jax.random.PRNGKey(0)
    kx, k1, k2, k3, k4, k5, k6 = jax.random.split(key, 7)

    # 16x16 grayscale, batch=5: conv1->12x12, pool->6x6, conv2->2x2, pool->1x1,
    # so Flatten(50): (5*20,) -> (2, 50), fc2 -> (2, 10).
    x = jax.random.normal(kx, (5, 1, 16, 16), dtype=jnp.float32)
    params = {
        "conv1_w": jax.random.normal(k1, (10, 1, 5, 5), jnp.float32) * 0.2,
        "conv1_b": jax.random.normal(k2, (10,), jnp.float32) * 0.1,
        "conv2_w": jax.random.normal(k3, (20, 10, 5, 5), jnp.float32) * 0.063,
        "conv2_b": jax.random.normal(k4, (20,), jnp.float32) * 0.05,
        "fc2_w": jax.random.normal(k5, (10, 50), jnp.float32) * 0.14,
        "fc2_b": jax.random.normal(k6, (10,), jnp.float32) * 0.05,
    }

    out = jax.jit(lenet_forward)(x, params)
    out = jax.block_until_ready(out)

    assert out.shape == (2, 10), out.shape
    # log_softmax rows must exponentiate-sum to 1
    assert bool(jnp.allclose(jnp.exp(out).sum(axis=-1), 1.0, atol=1e-4))
    # end-to-end agreement with a plain-JAX reference (tolerance allows for
    # TPU matmul rounding differences between the two formulations)
    ref = _reference_forward(x, params)
    assert bool(jnp.allclose(out, ref, atol=5e-2, rtol=5e-2)), (out, ref)

    print("KERNEL_OK")
</pallas_src>

<mosaic_0001>
module attributes {stable_mosaic.version = 11 : i64} {
  func.func @kernel(%arg0: i32, %arg1: memref<80x16xf32, #tpu.memory_space<vmem>>, %arg2: memref<5x16x120xf32, #tpu.memory_space<vmem>>, %arg3: memref<5x60x80xf32, #tpu.memory_space<vmem>>, %arg4: memref<1x120xf32, #tpu.memory_space<vmem>>, %arg5: memref<2x120x60xf32, #tpu.memory_space<vmem>>, %arg6: memref<2x30x60xf32, #tpu.memory_space<vmem>>, %arg7: memref<5x60x40xf32, #tpu.memory_space<vmem>>, %arg8: memref<5x10x30xf32, #tpu.memory_space<vmem>>, %arg9: memref<1x40xf32, #tpu.memory_space<vmem>>, %arg10: memref<2x40x20xf32, #tpu.memory_space<vmem>>, %arg11: memref<2x5x10xf32, #tpu.memory_space<vmem>>, %arg12: memref<6x2x5xf32, #tpu.memory_space<vmem>>, %arg13: memref<6x20x10xf32, #tpu.memory_space<vmem>>, %arg14: memref<1x10xf32, #tpu.memory_space<vmem>>, %arg15: memref<2x10xf32, #tpu.memory_space<vmem>>) attributes {dimension_semantics = [#tpu.dimension_semantics<arbitrary>], iteration_bounds = array<i64: 1>, scalar_prefetch = 0 : i64, scratch_operands = 0 : i64, tpu.core_type = #tpu.core_type<tc>, window_params = [{pipeline_mode = #tpu.pipeline_mode<synchronous>, transform_indices = @transform_0, window_bounds = array<i64: 80, 16>}, {pipeline_mode = #tpu.pipeline_mode<synchronous>, transform_indices = @transform_1, window_bounds = array<i64: 5, 16, 120>}, {pipeline_mode = #tpu.pipeline_mode<synchronous>, transform_indices = @transform_2, window_bounds = array<i64: 5, 60, 80>}, {pipeline_mode = #tpu.pipeline_mode<synchronous>, transform_indices = @transform_3, window_bounds = array<i64: 1, 120>}, {pipeline_mode = #tpu.pipeline_mode<synchronous>, transform_indices = @transform_4, window_bounds = array<i64: 2, 120, 60>}, {pipeline_mode = #tpu.pipeline_mode<synchronous>, transform_indices = @transform_5, window_bounds = array<i64: 2, 30, 60>}, {pipeline_mode = #tpu.pipeline_mode<synchronous>, transform_indices = @transform_6, window_bounds = array<i64: 5, 60, 40>}, {pipeline_mode = #tpu.pipeline_mode<synchronous>, transform_indices = @transform_7, window_bounds = array<i64: 5, 10, 30>}, {pipeline_mode = #tpu.pipeline_mode<synchronous>, transform_indices = @transform_8, window_bounds = array<i64: 1, 40>}, {pipeline_mode = #tpu.pipeline_mode<synchronous>, transform_indices = @transform_9, window_bounds = array<i64: 2, 40, 20>}, {pipeline_mode = #tpu.pipeline_mode<synchronous>, transform_indices = @transform_10, window_bounds = array<i64: 2, 5, 10>}, {pipeline_mode = #tpu.pipeline_mode<synchronous>, transform_indices = @transform_11, window_bounds = array<i64: 6, 2, 5>}, {pipeline_mode = #tpu.pipeline_mode<synchronous>, transform_indices = @transform_12, window_bounds = array<i64: 6, 20, 10>}, {pipeline_mode = #tpu.pipeline_mode<synchronous>, transform_indices = @transform_13, window_bounds = array<i64: 1, 10>}, {pipeline_mode = #tpu.pipeline_mode<synchronous>, transform_indices = @transform_14, window_bounds = array<i64: 2, 10>}]} {
    %c0 = arith.constant 0 : index
    %c0_0 = arith.constant 0 : index
    %0 = vector.load %arg1[%c0, %c0_0] : memref<80x16xf32, #tpu.memory_space<vmem>>, vector<80x16xf32>
    %c0_1 = arith.constant 0 : index
    %c0_2 = arith.constant 0 : index
    %c0_3 = arith.constant 0 : index
    %1 = vector.load %arg3[%c0_1, %c0_2, %c0_3] : memref<5x60x80xf32, #tpu.memory_space<vmem>>, vector<1x60x80xf32>
    %2 = vector.shape_cast %1 : vector<1x60x80xf32> to vector<60x80xf32>
    %c0_4 = arith.constant 0 : index
    %c0_5 = arith.constant 0 : index
    %c0_6 = arith.constant 0 : index
    %3 = vector.load %arg2[%c0_4, %c0_5, %c0_6] : memref<5x16x120xf32, #tpu.memory_space<vmem>>, vector<1x16x120xf32>
    %4 = vector.shape_cast %3 : vector<1x16x120xf32> to vector<16x120xf32>
    %cst = arith.constant dense<0.000000e+00> : vector<80x120xf32>
    %5 = tpu.matmul %0, %4, %cst {dimension_numbers = #tpu.dot_dimension_numbers<[1], [0], [0], [1], [0, 0, 1, 1], [], []>} : vector<80x16xf32>, vector<16x120xf32>, vector<80x120xf32> -> vector<80x120xf32>
    %cst_7 = arith.constant dense<0.000000e+00> : vector<60x120xf32>
    %6 = tpu.matmul %2, %5, %cst_7 {dimension_numbers = #tpu.dot_dimension_numbers<[1], [0], [0], [1], [0, 0, 1, 1], [], []>} : vector<60x80xf32>, vector<80x120xf32>, vector<60x120xf32> -> vector<60x120xf32>
    %c1 = arith.constant 1 : index
    %c0_8 = arith.constant 0 : index
    %c0_9 = arith.constant 0 : index
    %7 = vector.load %arg3[%c1, %c0_8, %c0_9] : memref<5x60x80xf32, #tpu.memory_space<vmem>>, vector<1x60x80xf32>
    %8 = vector.shape_cast %7 : vector<1x60x80xf32> to vector<60x80xf32>
    %c1_10 = arith.constant 1 : index
    %c0_11 = arith.constant 0 : index
    %c0_12 = arith.constant 0 : index
    %9 = vector.load %arg2[%c1_10, %c0_11, %c0_12] : memref<5x16x120xf32, #tpu.memory_space<vmem>>, vector<1x16x120xf32>
    %10 = vector.shape_cast %9 : vector<1x16x120xf32> to vector<16x120xf32>
    %cst_13 = arith.constant dense<0.000000e+00> : vector<80x120xf32>
    %11 = tpu.matmul %0, %10, %cst_13 {dimension_numbers = #tpu.dot_dimension_numbers<[1], [0], [0], [1], [0, 0, 1, 1], [], []>} : vector<80x16xf32>, vector<16x120xf32>, vector<80x120xf32> -> vector<80x120xf32>
    %cst_14 = arith.constant dense<0.000000e+00> : vector<60x120xf32>
    %12 = tpu.matmul %8, %11, %cst_14 {dimension_numbers = #tpu.dot_dimension_numbers<[1], [0], [0], [1], [0, 0, 1, 1], [], []>} : vector<60x80xf32>, vector<80x120xf32>, vector<60x120xf32> -> vector<60x120xf32>
    %13 = arith.addf %6, %12 : vector<60x120xf32>
    %c2 = arith.constant 2 : index
    %c0_15 = arith.constant 0 : index
    %c0_16 = arith.constant 0 : index
    %14 = vector.load %arg3[%c2, %c0_15, %c0_16] : memref<5x60x80xf32, #tpu.memory_space<vmem>>, vector<1x60x80xf32>
    %15 = vector.shape_cast %14 : vector<1x60x80xf32> to vector<60x80xf32>
    %c2_17 = arith.constant 2 : index
    %c0_18 = arith.constant 0 : index
    %c0_19 = arith.constant 0 : index
    %16 = vector.load %arg2[%c2_17, %c0_18, %c0_19] : memref<5x16x120xf32, #tpu.memory_space<vmem>>, vector<1x16x120xf32>
    %17 = vector.shape_cast %16 : vector<1x16x120xf32> to vector<16x120xf32>
    %cst_20 = arith.constant dense<0.000000e+00> : vector<80x120xf32>
    %18 = tpu.matmul %0, %17, %cst_20 {dimension_numbers = #tpu.dot_dimension_numbers<[1], [0], [0], [1], [0, 0, 1, 1], [], []>} : vector<80x16xf32>, vector<16x120xf32>, vector<80x120xf32> -> vector<80x120xf32>
    %cst_21 = arith.constant dense<0.000000e+00> : vector<60x120xf32>
    %19 = tpu.matmul %15, %18, %cst_21 {dimension_numbers = #tpu.dot_dimension_numbers<[1], [0], [0], [1], [0, 0, 1, 1], [], []>} : vector<60x80xf32>, vector<80x120xf32>, vector<60x120xf32> -> vector<60x120xf32>
    %20 = arith.addf %13, %19 : vector<60x120xf32>
    %c3 = arith.constant 3 : index
    %c0_22 = arith.constant 0 : index
    %c0_23 = arith.constant 0 : index
    %21 = vector.load %arg3[%c3, %c0_22, %c0_23] : memref<5x60x80xf32, #tpu.memory_space<vmem>>, vector<1x60x80xf32>
    %22 = vector.shape_cast %21 : vector<1x60x80xf32> to vector<60x80xf32>
    %c3_24 = arith.constant 3 : index
    %c0_25 = arith.constant 0 : index
    %c0_26 = arith.constant 0 : index
    %23 = vector.load %arg2[%c3_24, %c0_25, %c0_26] : memref<5x16x120xf32, #tpu.memory_space<vmem>>, vector<1x16x120xf32>
    %24 = vector.shape_cast %23 : vector<1x16x120xf32> to vector<16x120xf32>
    %cst_27 = arith.constant dense<0.000000e+00> : vector<80x120xf32>
    %25 = tpu.matmul %0, %24, %cst_27 {dimension_numbers = #tpu.dot_dimension_numbers<[1], [0], [0], [1], [0, 0, 1, 1], [], []>} : vector<80x16xf32>, vector<16x120xf32>, vector<80x120xf32> -> vector<80x120xf32>
    %cst_28 = arith.constant dense<0.000000e+00> : vector<60x120xf32>
    %26 = tpu.matmul %22, %25, %cst_28 {dimension_numbers = #tpu.dot_dimension_numbers<[1], [0], [0], [1], [0, 0, 1, 1], [], []>} : vector<60x80xf32>, vector<80x120xf32>, vector<60x120xf32> -> vector<60x120xf32>
    %27 = arith.addf %20, %26 : vector<60x120xf32>
    %c4 = arith.constant 4 : index
    %c0_29 = arith.constant 0 : index
    %c0_30 = arith.constant 0 : index
    %28 = vector.load %arg3[%c4, %c0_29, %c0_30] : memref<5x60x80xf32, #tpu.memory_space<vmem>>, vector<1x60x80xf32>
    %29 = vector.shape_cast %28 : vector<1x60x80xf32> to vector<60x80xf32>
    %c4_31 = arith.constant 4 : index
    %c0_32 = arith.constant 0 : index
    %c0_33 = arith.constant 0 : index
    %30 = vector.load %arg2[%c4_31, %c0_32, %c0_33] : memref<5x16x120xf32, #tpu.memory_space<vmem>>, vector<1x16x120xf32>
    %31 = vector.shape_cast %30 : vector<1x16x120xf32> to vector<16x120xf32>
    %cst_34 = arith.constant dense<0.000000e+00> : vector<80x120xf32>
    %32 = tpu.matmul %0, %31, %cst_34 {dimension_numbers = #tpu.dot_dimension_numbers<[1], [0], [0], [1], [0, 0, 1, 1], [], []>} : vector<80x16xf32>, vector<16x120xf32>, vector<80x120xf32> -> vector<80x120xf32>
    %cst_35 = arith.constant dense<0.000000e+00> : vector<60x120xf32>
    %33 = tpu.matmul %29, %32, %cst_35 {dimension_numbers = #tpu.dot_dimension_numbers<[1], [0], [0], [1], [0, 0, 1, 1], [], []>} : vector<60x80xf32>, vector<80x120xf32>, vector<60x120xf32> -> vector<60x120xf32>
    %34 = arith.addf %27, %33 : vector<60x120xf32>
    %c0_36 = arith.constant 0 : index
    %c0_37 = arith.constant 0 : index
    %35 = vector.load %arg4[%c0_36, %c0_37] : memref<1x120xf32, #tpu.memory_space<vmem>>, vector<1x120xf32>
    %36 = vector.broadcast %35 : vector<1x120xf32> to vector<60x120xf32>
    %37 = arith.addf %34, %36 : vector<60x120xf32>
    %c0_38 = arith.constant 0 : index
    %c0_39 = arith.constant 0 : index
    %c0_40 = arith.constant 0 : index
    %38 = vector.load %arg5[%c0_38, %c0_39, %c0_40] : memref<2x120x60xf32, #tpu.memory_space<vmem>>, vector<1x120x60xf32>
    %39 = vector.shape_cast %38 : vector<1x120x60xf32> to vector<120x60xf32>
    %cst_41 = arith.constant dense<0.000000e+00> : vector<60x60xf32>
    %40 = tpu.matmul %37, %39, %cst_41 {dimension_numbers = #tpu.dot_dimension_numbers<[1], [0], [0], [1], [0, 0, 1, 1], [], []>} : vector<60x120xf32>, vector<120x60xf32>, vector<60x60xf32> -> vector<60x60xf32>
    %c1_42 = arith.constant 1 : index
    %c0_43 = arith.constant 0 : index
    %c0_44 = arith.constant 0 : index
    %41 = vector.load %arg5[%c1_42, %c0_43, %c0_44] : memref<2x120x60xf32, #tpu.memory_space<vmem>>, vector<1x120x60xf32>
    %42 = vector.shape_cast %41 : vector<1x120x60xf32> to vector<120x60xf32>
    %cst_45 = arith.constant dense<0.000000e+00> : vector<60x60xf32>
    %43 = tpu.matmul %37, %42, %cst_45 {dimension_numbers = #tpu.dot_dimension_numbers<[1], [0], [0], [1], [0, 0, 1, 1], [], []>} : vector<60x120xf32>, vector<120x60xf32>, vector<60x60xf32> -> vector<60x60xf32>
    %44 = arith.maximumf %40, %43 : vector<60x60xf32>
    %c0_46 = arith.constant 0 : index
    %c0_47 = arith.constant 0 : index
    %c0_48 = arith.constant 0 : index
    %45 = vector.load %arg6[%c0_46, %c0_47, %c0_48] : memref<2x30x60xf32, #tpu.memory_space<vmem>>, vector<1x30x60xf32>
    %46 = vector.shape_cast %45 : vector<1x30x60xf32> to vector<30x60xf32>
    %cst_49 = arith.constant dense<0.000000e+00> : vector<30x60xf32>
    %47 = tpu.matmul %46, %44, %cst_49 {dimension_numbers = #tpu.dot_dimension_numbers<[1], [0], [0], [1], [0, 0, 1, 1], [], []>} : vector<30x60xf32>, vector<60x60xf32>, vector<30x60xf32> -> vector<30x60xf32>
    %c1_50 = arith.constant 1 : index
    %c0_51 = arith.constant 0 : index
    %c0_52 = arith.constant 0 : index
    %48 = vector.load %arg6[%c1_50, %c0_51, %c0_52] : memref<2x30x60xf32, #tpu.memory_space<vmem>>, vector<1x30x60xf32>
    %49 = vector.shape_cast %48 : vector<1x30x60xf32> to vector<30x60xf32>
    %cst_53 = arith.constant dense<0.000000e+00> : vector<30x60xf32>
    %50 = tpu.matmul %49, %44, %cst_53 {dimension_numbers = #tpu.dot_dimension_numbers<[1], [0], [0], [1], [0, 0, 1, 1], [], []>} : vector<30x60xf32>, vector<60x60xf32>, vector<30x60xf32> -> vector<30x60xf32>
    %51 = arith.maximumf %47, %50 : vector<30x60xf32>
    %cst_54 = arith.constant 0.000000e+00 : f32
    %52 = vector.broadcast %cst_54 : f32 to vector<30x60xf32>
    %53 = arith.maximumf %51, %52 : vector<30x60xf32>
    %c0_55 = arith.constant 0 : index
    %c0_56 = arith.constant 0 : index
    %c0_57 = arith.constant 0 : index
    %54 = vector.load %arg8[%c0_55, %c0_56, %c0_57] : memref<5x10x30xf32, #tpu.memory_space<vmem>>, vector<1x10x30xf32>
    %55 = vector.shape_cast %54 : vector<1x10x30xf32> to vector<10x30xf32>
    %c0_58 = arith.constant 0 : index
    %c0_59 = arith.constant 0 : index
    %c0_60 = arith.constant 0 : index
    %56 = vector.load %arg7[%c0_58, %c0_59, %c0_60] : memref<5x60x40xf32, #tpu.memory_space<vmem>>, vector<1x60x40xf32>
    %57 = vector.shape_cast %56 : vector<1x60x40xf32> to vector<60x40xf32>
    %cst_61 = arith.constant dense<0.000000e+00> : vector<30x40xf32>
    %58 = tpu.matmul %53, %57, %cst_61 {dimension_numbers = #tpu.dot_dimension_numbers<[1], [0], [0], [1], [0, 0, 1, 1], [], []>} : vector<30x60xf32>, vector<60x40xf32>, vector<30x40xf32> -> vector<30x40xf32>
    %cst_62 = arith.constant dense<0.000000e+00> : vector<10x40xf32>
    %59 = tpu.matmul %55, %58, %cst_62 {dimension_numbers = #tpu.dot_dimension_numbers<[1], [0], [0], [1], [0, 0, 1, 1], [], []>} : vector<10x30xf32>, vector<30x40xf32>, vector<10x40xf32> -> vector<10x40xf32>
    %c1_63 = arith.constant 1 : index
    %c0_64 = arith.constant 0 : index
    %c0_65 = arith.constant 0 : index
    %60 = vector.load %arg8[%c1_63, %c0_64, %c0_65] : memref<5x10x30xf32, #tpu.memory_space<vmem>>, vector<1x10x30xf32>
    %61 = vector.shape_cast %60 : vector<1x10x30xf32> to vector<10x30xf32>
    %c1_66 = arith.constant 1 : index
    %c0_67 = arith.constant 0 : index
    %c0_68 = arith.constant 0 : index
    %62 = vector.load %arg7[%c1_66, %c0_67, %c0_68] : memref<5x60x40xf32, #tpu.memory_space<vmem>>, vector<1x60x40xf32>
    %63 = vector.shape_cast %62 : vector<1x60x40xf32> to vector<60x40xf32>
    %cst_69 = arith.constant dense<0.000000e+00> : vector<30x40xf32>
    %64 = tpu.matmul %53, %63, %cst_69 {dimension_numbers = #tpu.dot_dimension_numbers<[1], [0], [0], [1], [0, 0, 1, 1], [], []>} : vector<30x60xf32>, vector<60x40xf32>, vector<30x40xf32> -> vector<30x40xf32>
    %cst_70 = arith.constant dense<0.000000e+00> : vector<10x40xf32>
    %65 = tpu.matmul %61, %64, %cst_70 {dimension_numbers = #tpu.dot_dimension_numbers<[1], [0], [0], [1], [0, 0, 1, 1], [], []>} : vector<10x30xf32>, vector<30x40xf32>, vector<10x40xf32> -> vector<10x40xf32>
    %66 = arith.addf %59, %65 : vector<10x40xf32>
    %c2_71 = arith.constant 2 : index
    %c0_72 = arith.constant 0 : index
    %c0_73 = arith.constant 0 : index
    %67 = vector.load %arg8[%c2_71, %c0_72, %c0_73] : memref<5x10x30xf32, #tpu.memory_space<vmem>>, vector<1x10x30xf32>
    %68 = vector.shape_cast %67 : vector<1x10x30xf32> to vector<10x30xf32>
    %c2_74 = arith.constant 2 : index
    %c0_75 = arith.constant 0 : index
    %c0_76 = arith.constant 0 : index
    %69 = vector.load %arg7[%c2_74, %c0_75, %c0_76] : memref<5x60x40xf32, #tpu.memory_space<vmem>>, vector<1x60x40xf32>
    %70 = vector.shape_cast %69 : vector<1x60x40xf32> to vector<60x40xf32>
    %cst_77 = arith.constant dense<0.000000e+00> : vector<30x40xf32>
    %71 = tpu.matmul %53, %70, %cst_77 {dimension_numbers = #tpu.dot_dimension_numbers<[1], [0], [0], [1], [0, 0, 1, 1], [], []>} : vector<30x60xf32>, vector<60x40xf32>, vector<30x40xf32> -> vector<30x40xf32>
    %cst_78 = arith.constant dense<0.000000e+00> : vector<10x40xf32>
    %72 = tpu.matmul %68, %71, %cst_78 {dimension_numbers = #tpu.dot_dimension_numbers<[1], [0], [0], [1], [0, 0, 1, 1], [], []>} : vector<10x30xf32>, vector<30x40xf32>, vector<10x40xf32> -> vector<10x40xf32>
    %73 = arith.addf %66, %72 : vector<10x40xf32>
    %c3_79 = arith.constant 3 : index
    %c0_80 = arith.constant 0 : index
    %c0_81 = arith.constant 0 : index
    %74 = vector.load %arg8[%c3_79, %c0_80, %c0_81] : memref<5x10x30xf32, #tpu.memory_space<vmem>>, vector<1x10x30xf32>
    %75 = vector.shape_cast %74 : vector<1x10x30xf32> to vector<10x30xf32>
    %c3_82 = arith.constant 3 : index
    %c0_83 = arith.constant 0 : index
    %c0_84 = arith.constant 0 : index
    %76 = vector.load %arg7[%c3_82, %c0_83, %c0_84] : memref<5x60x40xf32, #tpu.memory_space<vmem>>, vector<1x60x40xf32>
    %77 = vector.shape_cast %76 : vector<1x60x40xf32> to vector<60x40xf32>
    %cst_85 = arith.constant dense<0.000000e+00> : vector<30x40xf32>
    %78 = tpu.matmul %53, %77, %cst_85 {dimension_numbers = #tpu.dot_dimension_numbers<[1], [0], [0], [1], [0, 0, 1, 1], [], []>} : vector<30x60xf32>, vector<60x40xf32>, vector<30x40xf32> -> vector<30x40xf32>
    %cst_86 = arith.constant dense<0.000000e+00> : vector<10x40xf32>
    %79 = tpu.matmul %75, %78, %cst_86 {dimension_numbers = #tpu.dot_dimension_numbers<[1], [0], [0], [1], [0, 0, 1, 1], [], []>} : vector<10x30xf32>, vector<30x40xf32>, vector<10x40xf32> -> vector<10x40xf32>
    %80 = arith.addf %73, %79 : vector<10x40xf32>
    %c4_87 = arith.constant 4 : index
    %c0_88 = arith.constant 0 : index
    %c0_89 = arith.constant 0 : index
    %81 = vector.load %arg8[%c4_87, %c0_88, %c0_89] : memref<5x10x30xf32, #tpu.memory_space<vmem>>, vector<1x10x30xf32>
    %82 = vector.shape_cast %81 : vector<1x10x30xf32> to vector<10x30xf32>
    %c4_90 = arith.constant 4 : index
    %c0_91 = arith.constant 0 : index
    %c0_92 = arith.constant 0 : index
    %83 = vector.load %arg7[%c4_90, %c0_91, %c0_92] : memref<5x60x40xf32, #tpu.memory_space<vmem>>, vector<1x60x40xf32>
    %84 = vector.shape_cast %83 : vector<1x60x40xf32> to vector<60x40xf32>
    %cst_93 = arith.constant dense<0.000000e+00> : vector<30x40xf32>
    %85 = tpu.matmul %53, %84, %cst_93 {dimension_numbers = #tpu.dot_dimension_numbers<[1], [0], [0], [1], [0, 0, 1, 1], [], []>} : vector<30x60xf32>, vector<60x40xf32>, vector<30x40xf32> -> vector<30x40xf32>
    %cst_94 = arith.constant dense<0.000000e+00> : vector<10x40xf32>
    %86 = tpu.matmul %82, %85, %cst_94 {dimension_numbers = #tpu.dot_dimension_numbers<[1], [0], [0], [1], [0, 0, 1, 1], [], []>} : vector<10x30xf32>, vector<30x40xf32>, vector<10x40xf32> -> vector<10x40xf32>
    %87 = arith.addf %80, %86 : vector<10x40xf32>
    %c0_95 = arith.constant 0 : index
    %c0_96 = arith.constant 0 : index
    %88 = vector.load %arg9[%c0_95, %c0_96] : memref<1x40xf32, #tpu.memory_space<vmem>>, vector<1x40xf32>
    %89 = vector.broadcast %88 : vector<1x40xf32> to vector<10x40xf32>
    %90 = arith.addf %87, %89 : vector<10x40xf32>
    %c0_97 = arith.constant 0 : index
    %c0_98 = arith.constant 0 : index
    %c0_99 = arith.constant 0 : index
    %91 = vector.load %arg10[%c0_97, %c0_98, %c0_99] : memref<2x40x20xf32, #tpu.memory_space<vmem>>, vector<1x40x20xf32>
    %92 = vector.shape_cast %91 : vector<1x40x20xf32> to vector<40x20xf32>
    %cst_100 = arith.constant dense<0.000000e+00> : vector<10x20xf32>
    %93 = tpu.matmul %90, %92, %cst_100 {dimension_numbers = #tpu.dot_dimension_numbers<[1], [0], [0], [1], [0, 0, 1, 1], [], []>} : vector<10x40xf32>, vector<40x20xf32>, vector<10x20xf32> -> vector<10x20xf32>
    %c1_101 = arith.constant 1 : index
    %c0_102 = arith.constant 0 : index
    %c0_103 = arith.constant 0 : index
    %94 = vector.load %arg10[%c1_101, %c0_102, %c0_103] : memref<2x40x20xf32, #tpu.memory_space<vmem>>, vector<1x40x20xf32>
    %95 = vector.shape_cast %94 : vector<1x40x20xf32> to vector<40x20xf32>
    %cst_104 = arith.constant dense<0.000000e+00> : vector<10x20xf32>
    %96 = tpu.matmul %90, %95, %cst_104 {dimension_numbers = #tpu.dot_dimension_numbers<[1], [0], [0], [1], [0, 0, 1, 1], [], []>} : vector<10x40xf32>, vector<40x20xf32>, vector<10x20xf32> -> vector<10x20xf32>
    %97 = arith.maximumf %93, %96 : vector<10x20xf32>
    %c0_105 = arith.constant 0 : index
    %c0_106 = arith.constant 0 : index
    %c0_107 = arith.constant 0 : index
    %98 = vector.load %arg11[%c0_105, %c0_106, %c0_107] : memref<2x5x10xf32, #tpu.memory_space<vmem>>, vector<1x5x10xf32>
    %99 = vector.shape_cast %98 : vector<1x5x10xf32> to vector<5x10xf32>
    %cst_108 = arith.constant dense<0.000000e+00> : vector<5x20xf32>
    %100 = tpu.matmul %99, %97, %cst_108 {dimension_numbers = #tpu.dot_dimension_numbers<[1], [0], [0], [1], [0, 0, 1, 1], [], []>} : vector<5x10xf32>, vector<10x20xf32>, vector<5x20xf32> -> vector<5x20xf32>
    %c1_109 = arith.constant 1 : index
    %c0_110 = arith.constant 0 : index
    %c0_111 = arith.constant 0 : index
    %101 = vector.load %arg11[%c1_109, %c0_110, %c0_111] : memref<2x5x10xf32, #tpu.memory_space<vmem>>, vector<1x5x10xf32>
    %102 = vector.shape_cast %101 : vector<1x5x10xf32> to vector<5x10xf32>
    %cst_112 = arith.constant dense<0.000000e+00> : vector<5x20xf32>
    %103 = tpu.matmul %102, %97, %cst_112 {dimension_numbers = #tpu.dot_dimension_numbers<[1], [0], [0], [1], [0, 0, 1, 1], [], []>} : vector<5x10xf32>, vector<10x20xf32>, vector<5x20xf32> -> vector<5x20xf32>
    %104 = arith.maximumf %100, %103 : vector<5x20xf32>
    %cst_113 = arith.constant 0.000000e+00 : f32
    %105 = vector.broadcast %cst_113 : f32 to vector<5x20xf32>
    %106 = arith.maximumf %104, %105 : vector<5x20xf32>
    %c0_114 = arith.constant 0 : index
    %c0_115 = arith.constant 0 : index
    %c0_116 = arith.constant 0 : index
    %107 = vector.load %arg12[%c0_114, %c0_115, %c0_116] : memref<6x2x5xf32, #tpu.memory_space<vmem>>, vector<1x2x5xf32>
    %108 = vector.shape_cast %107 : vector<1x2x5xf32> to vector<2x5xf32>
    %cst_117 = arith.constant dense<0.000000e+00> : vector<2x20xf32>
    %109 = tpu.matmul %108, %106, %cst_117 {dimension_numbers = #tpu.dot_dimension_numbers<[1], [0], [0], [1], [0, 0, 1, 1], [], []>} : vector<2x5xf32>, vector<5x20xf32>, vector<2x20xf32> -> vector<2x20xf32>
    %c0_118 = arith.constant 0 : index
    %c0_119 = arith.constant 0 : index
    %c0_120 = arith.constant 0 : index
    %110 = vector.load %arg13[%c0_118, %c0_119, %c0_120] : memref<6x20x10xf32, #tpu.memory_space<vmem>>, vector<1x20x10xf32>
    %111 = vector.shape_cast %110 : vector<1x20x10xf32> to vector<20x10xf32>
    %cst_121 = arith.constant dense<0.000000e+00> : vector<2x10xf32>
    %112 = tpu.matmul %109, %111, %cst_121 {dimension_numbers = #tpu.dot_dimension_numbers<[1], [0], [0], [1], [0, 0, 1, 1], [], []>} : vector<2x20xf32>, vector<20x10xf32>, vector<2x10xf32> -> vector<2x10xf32>
    %c1_122 = arith.constant 1 : index
    %c0_123 = arith.constant 0 : index
    %c0_124 = arith.constant 0 : index
    %113 = vector.load %arg12[%c1_122, %c0_123, %c0_124] : memref<6x2x5xf32, #tpu.memory_space<vmem>>, vector<1x2x5xf32>
    %114 = vector.shape_cast %113 : vector<1x2x5xf32> to vector<2x5xf32>
    %cst_125 = arith.constant dense<0.000000e+00> : vector<2x20xf32>
    %115 = tpu.matmul %114, %106, %cst_125 {dimension_numbers = #tpu.dot_dimension_numbers<[1], [0], [0], [1], [0, 0, 1, 1], [], []>} : vector<2x5xf32>, vector<5x20xf32>, vector<2x20xf32> -> vector<2x20xf32>
    %c1_126 = arith.constant 1 : index
    %c0_127 = arith.constant 0 : index
    %c0_128 = arith.constant 0 : index
    %116 = vector.load %arg13[%c1_126, %c0_127, %c0_128] : memref<6x20x10xf32, #tpu.memory_space<vmem>>, vector<1x20x10xf32>
    %117 = vector.shape_cast %116 : vector<1x20x10xf32> to vector<20x10xf32>
    %cst_129 = arith.constant dense<0.000000e+00> : vector<2x10xf32>
    %118 = tpu.matmul %115, %117, %cst_129 {dimension_numbers = #tpu.dot_dimension_numbers<[1], [0], [0], [1], [0, 0, 1, 1], [], []>} : vector<2x20xf32>, vector<20x10xf32>, vector<2x10xf32> -> vector<2x10xf32>
    %119 = arith.addf %112, %118 : vector<2x10xf32>
    %c2_130 = arith.constant 2 : index
    %c0_131 = arith.constant 0 : index
    %c0_132 = arith.constant 0 : index
    %120 = vector.load %arg12[%c2_130, %c0_131, %c0_132] : memref<6x2x5xf32, #tpu.memory_space<vmem>>, vector<1x2x5xf32>
    %121 = vector.shape_cast %120 : vector<1x2x5xf32> to vector<2x5xf32>
    %cst_133 = arith.constant dense<0.000000e+00> : vector<2x20xf32>
    %122 = tpu.matmul %121, %106, %cst_133 {dimension_numbers = #tpu.dot_dimension_numbers<[1], [0], [0], [1], [0, 0, 1, 1], [], []>} : vector<2x5xf32>, vector<5x20xf32>, vector<2x20xf32> -> vector<2x20xf32>
    %c2_134 = arith.constant 2 : index
    %c0_135 = arith.constant 0 : index
    %c0_136 = arith.constant 0 : index
    %123 = vector.load %arg13[%c2_134, %c0_135, %c0_136] : memref<6x20x10xf32, #tpu.memory_space<vmem>>, vector<1x20x10xf32>
    %124 = vector.shape_cast %123 : vector<1x20x10xf32> to vector<20x10xf32>
    %cst_137 = arith.constant dense<0.000000e+00> : vector<2x10xf32>
    %125 = tpu.matmul %122, %124, %cst_137 {dimension_numbers = #tpu.dot_dimension_numbers<[1], [0], [0], [1], [0, 0, 1, 1], [], []>} : vector<2x20xf32>, vector<20x10xf32>, vector<2x10xf32> -> vector<2x10xf32>
    %126 = arith.addf %119, %125 : vector<2x10xf32>
    %c3_138 = arith.constant 3 : index
    %c0_139 = arith.constant 0 : index
    %c0_140 = arith.constant 0 : index
    %127 = vector.load %arg12[%c3_138, %c0_139, %c0_140] : memref<6x2x5xf32, #tpu.memory_space<vmem>>, vector<1x2x5xf32>
    %128 = vector.shape_cast %127 : vector<1x2x5xf32> to vector<2x5xf32>
    %cst_141 = arith.constant dense<0.000000e+00> : vector<2x20xf32>
    %129 = tpu.matmul %128, %106, %cst_141 {dimension_numbers = #tpu.dot_dimension_numbers<[1], [0], [0], [1], [0, 0, 1, 1], [], []>} : vector<2x5xf32>, vector<5x20xf32>, vector<2x20xf32> -> vector<2x20xf32>
    %c3_142 = arith.constant 3 : index
    %c0_143 = arith.constant 0 : index
    %c0_144 = arith.constant 0 : index
    %130 = vector.load %arg13[%c3_142, %c0_143, %c0_144] : memref<6x20x10xf32, #tpu.memory_space<vmem>>, vector<1x20x10xf32>
    %131 = vector.shape_cast %130 : vector<1x20x10xf32> to vector<20x10xf32>
    %cst_145 = arith.constant dense<0.000000e+00> : vector<2x10xf32>
    %132 = tpu.matmul %129, %131, %cst_145 {dimension_numbers = #tpu.dot_dimension_numbers<[1], [0], [0], [1], [0, 0, 1, 1], [], []>} : vector<2x20xf32>, vector<20x10xf32>, vector<2x10xf32> -> vector<2x10xf32>
    %133 = arith.addf %126, %132 : vector<2x10xf32>
    %c4_146 = arith.constant 4 : index
    %c0_147 = arith.constant 0 : index
    %c0_148 = arith.constant 0 : index
    %134 = vector.load %arg12[%c4_146, %c0_147, %c0_148] : memref<6x2x5xf32, #tpu.memory_space<vmem>>, vector<1x2x5xf32>
    %135 = vector.shape_cast %134 : vector<1x2x5xf32> to vector<2x5xf32>
    %cst_149 = arith.constant dense<0.000000e+00> : vector<2x20xf32>
    %136 = tpu.matmul %135, %106, %cst_149 {dimension_numbers = #tpu.dot_dimension_numbers<[1], [0], [0], [1], [0, 0, 1, 1], [], []>} : vector<2x5xf32>, vector<5x20xf32>, vector<2x20xf32> -> vector<2x20xf32>
    %c4_150 = arith.constant 4 : index
    %c0_151 = arith.constant 0 : index
    %c0_152 = arith.constant 0 : index
    %137 = vector.load %arg13[%c4_150, %c0_151, %c0_152] : memref<6x20x10xf32, #tpu.memory_space<vmem>>, vector<1x20x10xf32>
    %138 = vector.shape_cast %137 : vector<1x20x10xf32> to vector<20x10xf32>
    %cst_153 = arith.constant dense<0.000000e+00> : vector<2x10xf32>
    %139 = tpu.matmul %136, %138, %cst_153 {dimension_numbers = #tpu.dot_dimension_numbers<[1], [0], [0], [1], [0, 0, 1, 1], [], []>} : vector<2x20xf32>, vector<20x10xf32>, vector<2x10xf32> -> vector<2x10xf32>
    %140 = arith.addf %133, %139 : vector<2x10xf32>
    %c5 = arith.constant 5 : index
    %c0_154 = arith.constant 0 : index
    %c0_155 = arith.constant 0 : index
    %141 = vector.load %arg12[%c5, %c0_154, %c0_155] : memref<6x2x5xf32, #tpu.memory_space<vmem>>, vector<1x2x5xf32>
    %142 = vector.shape_cast %141 : vector<1x2x5xf32> to vector<2x5xf32>
    %cst_156 = arith.constant dense<0.000000e+00> : vector<2x20xf32>
    %143 = tpu.matmul %142, %106, %cst_156 {dimension_numbers = #tpu.dot_dimension_numbers<[1], [0], [0], [1], [0, 0, 1, 1], [], []>} : vector<2x5xf32>, vector<5x20xf32>, vector<2x20xf32> -> vector<2x20xf32>
    %c5_157 = arith.constant 5 : index
    %c0_158 = arith.constant 0 : index
    %c0_159 = arith.constant 0 : index
    %144 = vector.load %arg13[%c5_157, %c0_158, %c0_159] : memref<6x20x10xf32, #tpu.memory_space<vmem>>, vector<1x20x10xf32>
    %145 = vector.shape_cast %144 : vector<1x20x10xf32> to vector<20x10xf32>
    %cst_160 = arith.constant dense<0.000000e+00> : vector<2x10xf32>
    %146 = tpu.matmul %143, %145, %cst_160 {dimension_numbers = #tpu.dot_dimension_numbers<[1], [0], [0], [1], [0, 0, 1, 1], [], []>} : vector<2x20xf32>, vector<20x10xf32>, vector<2x10xf32> -> vector<2x10xf32>
    %147 = arith.addf %140, %146 : vector<2x10xf32>
    %c0_161 = arith.constant 0 : index
    %c0_162 = arith.constant 0 : index
    %148 = vector.load %arg14[%c0_161, %c0_162] : memref<1x10xf32, #tpu.memory_space<vmem>>, vector<1x10xf32>
    %149 = vector.broadcast %148 : vector<1x10xf32> to vector<2x10xf32>
    %150 = arith.addf %147, %149 : vector<2x10xf32>
    %cst_163 = arith.constant dense<0xFF800000> : vector<2xf32>
    %151 = vector.multi_reduction <maximumf>, %150, %cst_163 [1] : vector<2x10xf32> to vector<2xf32>
    %152 = vector.shape_cast %151 : vector<2xf32> to vector<2x1xf32>
    %153 = vector.broadcast %152 : vector<2x1xf32> to vector<2x10xf32>
    %154 = arith.subf %150, %153 : vector<2x10xf32>
    %155 = math.exp %154 : vector<2x10xf32>
    %cst_164 = arith.constant dense<0.000000e+00> : vector<2xf32>
    %156 = vector.multi_reduction <add>, %155, %cst_164 [1] : vector<2x10xf32> to vector<2xf32>
    %157 = vector.shape_cast %156 : vector<2xf32> to vector<2x1xf32>
    %158 = math.log %157 : vector<2x1xf32>
    %159 = vector.broadcast %158 : vector<2x1xf32> to vector<2x10xf32>
    %160 = arith.subf %154, %159 : vector<2x10xf32>
    %c0_165 = arith.constant 0 : index
    %c0_166 = arith.constant 0 : index
    %161 = vector.load %arg15[%c0_165, %c0_166] : memref<2x10xf32, #tpu.memory_space<vmem>>, vector<2x10xf32>
    tpu.vector_store %arg15[%c0_165, %c0_166], %160 {strides = array<i32>} : memref<2x10xf32, #tpu.memory_space<vmem>>, vector<2x10xf32>,
    return
  }
  func.func @transform_0(%arg0: i32) -> (i32, i32) {
    %c0_i32 = arith.constant 0 : i32
    %c0_i32_0 = arith.constant 0 : i32
    %c0_i32_1 = arith.constant 0 : i32
    return %c0_i32, %c0_i32_0 : i32, i32
  }
  func.func @transform_1(%arg0: i32) -> (i32, i32, i32) {
    %c0_i32 = arith.constant 0 : i32
    %c0_i32_0 = arith.constant 0 : i32
    %c0_i32_1 = arith.constant 0 : i32
    %c0_i32_2 = arith.constant 0 : i32
    return %c0_i32, %c0_i32_0, %c0_i32_1 : i32, i32, i32
  }
  func.func @transform_2(%arg0: i32) -> (i32, i32, i32) {
    %c0_i32 = arith.constant 0 : i32
    %c0_i32_0 = arith.constant 0 : i32
    %c0_i32_1 = arith.constant 0 : i32
    %c0_i32_2 = arith.constant 0 : i32
    return %c0_i32, %c0_i32_0, %c0_i32_1 : i32, i32, i32
  }
  func.func @transform_3(%arg0: i32) -> (i32, i32) {
    %c0_i32 = arith.constant 0 : i32
    %c0_i32_0 = arith.constant 0 : i32
    %c0_i32_1 = arith.constant 0 : i32
    return %c0_i32, %c0_i32_0 : i32, i32
  }
  func.func @transform_4(%arg0: i32) -> (i32, i32, i32) {
    %c0_i32 = arith.constant 0 : i32
    %c0_i32_0 = arith.constant 0 : i32
    %c0_i32_1 = arith.constant 0 : i32
    %c0_i32_2 = arith.constant 0 : i32
    return %c0_i32, %c0_i32_0, %c0_i32_1 : i32, i32, i32
  }
  func.func @transform_5(%arg0: i32) -> (i32, i32, i32) {
    %c0_i32 = arith.constant 0 : i32
    %c0_i32_0 = arith.constant 0 : i32
    %c0_i32_1 = arith.constant 0 : i32
    %c0_i32_2 = arith.constant 0 : i32
    return %c0_i32, %c0_i32_0, %c0_i32_1 : i32, i32, i32
  }
  func.func @transform_6(%arg0: i32) -> (i32, i32, i32) {
    %c0_i32 = arith.constant 0 : i32
    %c0_i32_0 = arith.constant 0 : i32
    %c0_i32_1 = arith.constant 0 : i32
    %c0_i32_2 = arith.constant 0 : i32
    return %c0_i32, %c0_i32_0, %c0_i32_1 : i32, i32, i32
  }
  func.func @transform_7(%arg0: i32) -> (i32, i32, i32) {
    %c0_i32 = arith.constant 0 : i32
    %c0_i32_0 = arith.constant 0 : i32
    %c0_i32_1 = arith.constant 0 : i32
    %c0_i32_2 = arith.constant 0 : i32
    return %c0_i32, %c0_i32_0, %c0_i32_1 : i32, i32, i32
  }
  func.func @transform_8(%arg0: i32) -> (i32, i32) {
    %c0_i32 = arith.constant 0 : i32
    %c0_i32_0 = arith.constant 0 : i32
    %c0_i32_1 = arith.constant 0 : i32
    return %c0_i32, %c0_i32_0 : i32, i32
  }
  func.func @transform_9(%arg0: i32) -> (i32, i32, i32) {
    %c0_i32 = arith.constant 0 : i32
    %c0_i32_0 = arith.constant 0 : i32
    %c0_i32_1 = arith.constant 0 : i32
    %c0_i32_2 = arith.constant 0 : i32
    return %c0_i32, %c0_i32_0, %c0_i32_1 : i32, i32, i32
  }
  func.func @transform_10(%arg0: i32) -> (i32, i32, i32) {
    %c0_i32 = arith.constant 0 : i32
    %c0_i32_0 = arith.constant 0 : i32
    %c0_i32_1 = arith.constant 0 : i32
    %c0_i32_2 = arith.constant 0 : i32
    return %c0_i32, %c0_i32_0, %c0_i32_1 : i32, i32, i32
  }
  func.func @transform_11(%arg0: i32) -> (i32, i32, i32) {
    %c0_i32 = arith.constant 0 : i32
    %c0_i32_0 = arith.constant 0 : i32
    %c0_i32_1 = arith.constant 0 : i32
    %c0_i32_2 = arith.constant 0 : i32
    return %c0_i32, %c0_i32_0, %c0_i32_1 : i32, i32, i32
  }
  func.func @transform_12(%arg0: i32) -> (i32, i32, i32) {
    %c0_i32 = arith.constant 0 : i32
    %c0_i32_0 = arith.constant 0 : i32
    %c0_i32_1 = arith.constant 0 : i32
    %c0_i32_2 = arith.constant 0 : i32
    return %c0_i32, %c0_i32_0, %c0_i32_1 : i32, i32, i32
  }
  func.func @transform_13(%arg0: i32) -> (i32, i32) {
    %c0_i32 = arith.constant 0 : i32
    %c0_i32_0 = arith.constant 0 : i32
    %c0_i32_1 = arith.constant 0 : i32
    return %c0_i32, %c0_i32_0 : i32, i32
  }
  func.func @transform_14(%arg0: i32) -> (i32, i32) {
    %c0_i32 = arith.constant 0 : i32
    %c0_i32_0 = arith.constant 0 : i32
    %c0_i32_1 = arith.constant 0 : i32
    return %c0_i32, %c0_i32_0 : i32, i32
  }
}

</mosaic_0001>

<bundles_post_ra>
// kernel: tile.13
= control target key start
LH: loop header
LB: loop body
LE: loop exit
PB: predicated region body
PF: predicated region fallthrough
CT: control target
= control target key end

     0   :  { %s28_s0 = inlined_call_operand.vmem [shape: f32[10], index: 0, kind: input, shape index: {}]   ;;  %s29_s1 = inlined_call_operand.vmem [shape: f32[12,10], index: 1, kind: output, shape index: {}]  }
   0x1   :  { %v4_v0 = vld [vmem:[%s28_s0] ss:$0 sm:$0xff] }
   0x2   :  { %5 = vst [vmem:[%s29_s1] sm:$0xff] %v4_v0  ;;  %8 = vst [vmem:[%s29_s1 + $0x8] sm:$0xff] %v4_v0 }

// kernel: tile.14
= control target key start
LH: loop header
LB: loop body
LE: loop exit
PB: predicated region body
PF: predicated region fallthrough
CT: control target
= control target key end

     0   :  { %s99_s10 = smov 110   ;;  %s100_s11 = smov 90   ;;  %vm3_vm0 = vcmask 80896   ;;  %vm9_vm1 = vcmask 982896   ;;  %vm15_vm2 = vcmask 900896   ;;  %vm21_vm3 = vcmask 818896   ;;  %s159_s0 = inlined_call_operand.vmem [shape: f32[12,10], index: 0, kind: input, shape index: {}]   ;;  %s160_s1 = inlined_call_operand.vmem [shape: f32[1,120], index: 1, kind: output, shape index: {}]  }
   0x1   :  { %v77_v0 = vld [vmem:[%s159_s0 + $0xb] sm:$0x1]   ;;  %v79_v1 = vld [vmem:[%s159_s0 + $0x9] sm:$0x1]   ;;  %v78_v2 = vld [vmem:[%s159_s0 + $0xa] sm:$0x1]  }
   0x2   :  { %7 = vrot.lane.b32.xlu0 %v77_v0, %s99_s10  ;;  %19 = vrot.lane.b32.xlu1 %v79_v1, %s100_s11  ;;  %v80_v3 = vld [vmem:[%s159_s0 + $0x8] sm:$0x1]   ;;  %s101_s16 = smov 100   ;;  %s102_s17 = smov 80   ;;  %v81_v4 = vld [vmem:[%s159_s0 + $0x7] sm:$0x1]  }
   0x3   :  { %v2_v5 = vld [vmem:[%s159_s0] sm:$0x1]   ;;  %v82_v6 = vld [vmem:[%s159_s0 + $0x6] sm:$0x1]   ;;  %s103_s24 = smov 70   ;;  %s104_s25 = smov 60  }
   0x4   :  { %4 = vst.msk [vmem:[#allocation0] sm:$0x1] %vm3_vm0, %v2_v5   ;;  %v83_v7 = vld [vmem:[%s159_s0 + $0x5] sm:$0x1]   ;;  %v84_v8 = vld [vmem:[%s159_s0 + $0x4] sm:$0x1]  }
   0x5   :  { %s105_s30 = smov 50   ;;  %s106_s2 = smov 40   ;;  %v85_v9 = vld [vmem:[%s159_s0 + $0x3] sm:$0x1]   ;;  %v86_v10 = vld [vmem:[%s159_s0 + $0x2] sm:$0x1]  }
   0x6   :  { %13 = vrot.lane.b32.xlu0 %v78_v2, %s101_s16  ;;  %25 = vrot.lane.b32.xlu1 %v80_v3, %s102_s17  ;;  %s107_s7 = smov 30   ;;  %s108_s8 = smov 20   ;;  %v87_v11 = vld [vmem:[%s159_s0 + $0x1] sm:$0x1]   ;;  %vm27_vm4 = vcmask 736896   ;;  %vm33_vm5 = vcmask 654896  }
   0x7   :  { %s109_s0 = smov 10   ;;  %vm39_vm6 = vcmask 572896   ;;  %vm45_vm7 = vcmask 490896   ;;  %vm51_vm8 = vcmask 408896   ;;  %vm57_vm9 = vcmask 326896  }
   0x8   :  { %vm63_vm10 = vcmask 244896   ;;  %vm69_vm11 = vcmask 162896  }
   0xa   :  { %31 = vrot.lane.b32.xlu0 %v81_v4, %s103_s24  ;;  %37 = vrot.lane.b32.xlu1 %v82_v6, %s104_s25 }
   0xe   :  { %43 = vrot.lane.b32.xlu0 %v83_v7, %s105_s30  ;;  %49 = vrot.lane.b32.xlu1 %v84_v8, %s106_s2 }
  0x12   :  { %55 = vrot.lane.b32.xlu0 %v85_v9, %s107_s7  ;;  %61 = vrot.lane.b32.xlu1 %v86_v10, %s108_s8 }
  0x16   :  { %67 = vrot.lane.b32.xlu0 %v87_v11, %s109_s0 }
  0x74   :  { %v8_v12 = vpop.permute.xlu0 %7   ;;  %v20_v13 = vpop.permute.xlu1 %19  }
  0x75   :  { %10 = vst.msk [vmem:[#allocation0] sm:$0x1] %vm9_vm1, %v8_v12  }
  0x78   :  { %v14_v14 = vpop.permute.xlu0 %13   ;;  %v26_v15 = vpop.permute.xlu1 %25  }
  0x79   :  { %16 = vst.msk [vmem:[#allocation0] sm:$0x1] %vm15_vm2, %v14_v14  }
  0x7a   :  { %22 = vst.msk [vmem:[#allocation0] sm:$0x1] %vm21_vm3, %v20_v13  }
  0x7b   :  { %28 = vst.msk [vmem:[#allocation0] sm:$0x1] %vm27_vm4, %v26_v15  }
  0x7c   :  { %v32_v16 = vpop.permute.xlu0 %31   ;;  %v38_v17 = vpop.permute.xlu1 %37  }
  0x7d   :  { %34 = vst.msk [vmem:[#allocation0] sm:$0x1] %vm33_vm5, %v32_v16  }
  0x7e   :  { %40 = vst.msk [vmem:[#allocation0] sm:$0x1] %vm39_vm6, %v38_v17  }
  0x80   :  { %v44_v18 = vpop.permute.xlu0 %43   ;;  %v50_v19 = vpop.permute.xlu1 %49  }
  0x81   :  { %46 = vst.msk [vmem:[#allocation0] sm:$0x1] %vm45_vm7, %v44_v18  }
  0x82   :  { %52 = vst.msk [vmem:[#allocation0] sm:$0x1] %vm51_vm8, %v50_v19  }
  0x84   :  { %v56_v20 = vpop.permute.xlu0 %55   ;;  %v62_v21 = vpop.permute.xlu1 %61  }
  0x85   :  { %58 = vst.msk [vmem:[#allocation0] sm:$0x1] %vm57_vm9, %v56_v20  }
  0x86   :  { %64 = vst.msk [vmem:[#allocation0] sm:$0x1] %vm63_vm10, %v62_v21  }
  0x88   :  { %v68_v22 = vpop.permute.xlu0 %67  }
  0x89   :  { %70 = vst.msk [vmem:[#allocation0] sm:$0x1] %vm69_vm11, %v68_v22  }
  0x90   :  { %v74_v23 = vld [vmem:[#allocation0] sm:$0x1] }
  0x91   :  { %76 = vst [vmem:[%s160_s1] sm:$0x1] %v74_v23 }

// kernel: tile.18
= control target key start
LH: loop header
LB: loop body
LE: loop exit
PB: predicated region body
PF: predicated region fallthrough
CT: control target
= control target key end

     0   :  { %s22_s0 = inlined_call_operand.vmem [shape: f32[20], index: 0, kind: input, shape index: {}]   ;;  %s23_s1 = inlined_call_operand.vmem [shape: f32[2,20], index: 1, kind: output, shape index: {}]  }
   0x1   :  { %v4_v0 = vld [vmem:[%s22_s0] ss:$0 sm:$0xff] }
   0x2   :  { %5 = vst [vmem:[%s23_s1] sm:$0x3] %v4_v0 }

// kernel: tile.19
= control target key start
LH: loop header
LB: loop body
LE: loop exit
PB: predicated region body
PF: predicated region fallthrough
CT: control target
= control target key end

     0   :  { %vm7_vm0 = vcmask 162816   ;;  %vm13_vm1 = vcmask 326816   ;;  %s39_s0 = inlined_call_operand.vmem [shape: f32[2,20], index: 0, kind: input, shape index: {}]   ;;  %s40_s1 = inlined_call_operand.vmem [shape: f32[1,40], index: 1, kind: output, shape index: {}]  }
   0x1   :  { %v4_v0 = vld [vmem:[%s39_s0] sm:$0x3]  ;;  %s22_s0 = smov 20  }
   0x2   :  { %5 = vst [vmem:[#allocation1] sm:$0x3] %v4_v0 }
   0x9   :  { %v10_v1 = vld [vmem:[#allocation1 + $0x1] sm:$0x1]   ;;  %v6_v2 = vld [vmem:[#allocation1] sm:$0x1]  }
   0xa   :  { %11 = vrot.lane.b32.xlu0 %v10_v1, %s22_s0  ;;  %8 = vst.msk [vmem:[#allocation0] sm:$0x1] %vm7_vm0, %v6_v2  }
  0x7c   :  { %v12_v3 = vpop.permute.xlu0 %11  }
  0x7d   :  { %14 = vst.msk [vmem:[#allocation0] sm:$0x1] %vm13_vm1, %v12_v3  }
  0x84   :  { %v18_v4 = vld [vmem:[#allocation0] sm:$0x1] }
  0x85   :  { %20 = vst [vmem:[%s40_s1] sm:$0x1] %v18_v4 }

// kernel: lenet_forward.1
= control target key start
LH: loop header
LB: loop body
LE: loop exit
PB: predicated region body
PF: predicated region fallthrough
CT: control target
= control target key end

     0   :  { %vm68_vm0 = vcmask 130048   ;;  %s6954_s0 = inlined_call_operand.vmem [shape: f32[80,16], index: 0, kind: input, shape index: {}]   ;;  %s6955_s1 = inlined_call_operand.vmem [shape: f32[5,16,120], index: 1, kind: input, shape index: {}]   ;;  %s6956_s2 = inlined_call_operand.vmem [shape: f32[5,60,80], index: 2, kind: input, shape index: {}]   ;;  %s6957_s3 = inlined_call_operand.vmem [shape: f32[1,120], index: 3, kind: input, shape index: {}]   ;;  %s6958_s4 = inlined_call_operand.vmem [shape: f32[2,120,60], index: 4, kind: input, shape index: {}]   ;;  %s6959_s5 = inlined_call_operand.vmem [shape: f32[2,30,60], index: 5, kind: input, shape index: {}]   ;;  %s6960_s6 = inlined_call_operand.vmem [shape: f32[5,60,40], index: 6, kind: input, shape index: {}]   ;;  %s6961_s7 = inlined_call_operand.vmem [shape: f32[5,10,30], index: 7, kind: input, shape index: {}]   ;;  %s6962_s8 = inlined_call_operand.vmem [shape: f32[1,40], index: 8, kind: input, shape index: {}]   ;;  %s6963_s9 = inlined_call_operand.vmem [shape: f32[2,40,20], index: 9, kind: input, shape index: {}]   ;;  %s6964_s10 = inlined_call_operand.vmem [shape: f32[2,5,10], index: 10, kind: input, shape index: {}]   ;;  %s6965_s11 = inlined_call_operand.vmem [shape: f32[6,2,5], index: 11, kind: input, shape index: {}]   ;;  %s6966_s12 = inlined_call_operand.vmem [shape: f32[6,20,10], index: 12, kind: input, shape index: {}]   ;;  %s6967_s13 = inlined_call_operand.vmem [shape: f32[1,10], index: 13, kind: input, shape index: {}]   ;;  %s6968_s14 = inlined_call_operand.hbm [shape: f32[2,10], index: 14, kind: output, shape index: {}]  }
   0x1   :  { %v4162_v0 = vld [vmem:[%s6955_s1 + $0x10] sm:$0xff]  ;;  %v4163_v1 = vld [vmem:[%s6955_s1 + $0x18] sm:$0xff]  ;;  %v6054_v2 = vld [vmem:[%s6954_s0] sm:$0xff] }
   0x2   :  { %v5502_v3 = vpack.c.bf16 %v4163_v1, %v4162_v0  ;;  %4849 = vmatprep.mubr.msk.f32.mxu1 %vm68_vm0, %v6054_v2  ;;  %4830 = vmatprep.mubr.msk.f32.mxu0 %vm68_vm0, %v6054_v2  ;;  %v66_v4 = vld [vmem:[%s6955_s1] sm:$0xff]  ;;  %v67_v5 = vld [vmem:[%s6955_s1 + $0x8] sm:$0xff]  ;;  %v6074_v7 = vld [vmem:[%s6954_s0 + $0x10] sm:$0xff] }
   0x3   :  { %v6069_v6 = vld [vmem:[%s6954_s0 + $0x8] sm:$0xff]  ;;  %v5498_v8 = vpack.c.bf16 %v67_v5, %v66_v4  ;;  %v4198_v9 = vld [vmem:[%s6955_s1 + $0x20] sm:$0xff]  ;;  %v4226_v11 = vld [vmem:[%s6955_s1 + $0x30] sm:$0xff] }
   0x4   :  { %5503 = vmatprep.subr.bf16.mxu1 %v5502_v3  ;;  %v4199_v10 = vld [vmem:[%s6955_s1 + $0x28] sm:$0xff]  ;;  %v4227_v12 = vld [vmem:[%s6955_s1 + $0x38] sm:$0xff] }
   0x5   :  { %5505 = vmatpush3.bf16.msra.mxu1 %v5502_v3  ;;  %5499 = vmatprep.subr.bf16.mxu0 %v5498_v8  ;;  %v5546_v13 = vpack.c.bf16 %v4199_v10, %v4198_v9  ;;  %v5570_v14 = vpack.c.bf16 %v4227_v12, %v4226_v11 }
   0x6   :  { %19 = vsyncpa [#allocation3], 0  ;;  %5501 = vmatpush3.bf16.msra.mxu0 %v5498_v8  ;;  %v51_v15 = vld [vmem:[%s6954_s0 + $0x18] sm:$0xff]  ;;  %v52_v16 = vld [vmem:[%s6954_s0 + $0x20] sm:$0xff]  ;;  %vm341_vm1 = vcmask 654336   ;;  %vm1422_vm2 = vcmask 982016  }
   0x7   :  { %5547 = vmatprep.subr.bf16.mxu1 %v5546_v13  ;;  %v53_v17 = vld [vmem:[%s6954_s0 + $0x28] sm:$0xff]  ;;  %v54_v18 = vld [vmem:[%s6954_s0 + $0x30] sm:$0xff]  ;;  %v55_v19 = vld [vmem:[%s6954_s0 + $0x38] sm:$0xff]  ;;  %vm1685_vm3 = vcmask 490496   ;;  %vm1698_vm4 = vcmask 1043456   ;;  %vm5965_vm5 = vmmov 1  }
   0x8   :  { %4850 = vmatmul.mubr.msk.f32.vlgmr.msra.gmra.mrb[0].mxu1 %vm68_vm0, %v6069_v6  ;;  %v56_v20 = vld [vmem:[%s6954_s0 + $0x40] sm:$0xff]  ;;  %v57_v21 = vld [vmem:[%s6954_s0 + $0x48] sm:$0xff]  ;;  %v1409_v28 = vld [vmem:[%s6958_s4 + $0x10] sm:$0xff]  ;;  %vm2107_vm7 = vcmask 244736   ;;  %vm2114_vm8 = vcmask 1045504   ;;  %vm2849_vm10 = vcmask 326656  }
   0x9   :  { %4852 = vmatprep.mubr.msk.f32.mxu1 %vm68_vm0, %v6074_v7  ;;  %5549 = vmatpush3.bf16.msra.mxu1 %v5546_v13  ;;  %v4254_v22 = vld [vmem:[%s6955_s1 + $0x40] sm:$0xff]  ;;  %v4255_v23 = vld [vmem:[%s6955_s1 + $0x48] sm:$0xff]  ;;  %v1410_v30 = vld [vmem:[%s6958_s4 + $0x18] sm:$0xff]  ;;  %vm5967_vm11 = vmmov 0   ;;  %vm3019_vm12 = vcmask 1041408   ;;  %vm3015_vm14 = vcmask 80896  }
   0xa   :  { %4831 = vmatmul.mubr.msk.f32.vlgmr.msra.gmra.mrb[0].mxu0 %vm68_vm0, %v6069_v6  ;;  %5571 = vmatprep.subr.bf16.mxu1 %v5570_v14  ;;  %v5594_v24 = vpack.c.bf16 %v4255_v23, %v4254_v22  ;;  %v4154_v25 = vld [vmem:[%s6956_s2 + $0x40] sm:$0xff]  ;;  %v1408_v27 = vld [vmem:[%s6958_s4 + $0x8] sm:$0xff]  ;;  %v5622_v31 = vpack.c.bf16 %v1410_v30, %v1409_v28  ;;  %v1413_v35 = vld [vmem:[%s6958_s4 + $0x30] sm:$0xff]  ;;  %vm3175_vm15 = vcmask 1044480  }
   0xb   :  { %4833 = vmatprep.mubr.msk.f32.mxu0 %vm68_vm0, %v6074_v7  ;;  %v1407_v26 = vld [vmem:[%s6958_s4] sm:$0xff]  ;;  %v1412_v33 = vld [vmem:[%s6958_s4 + $0x28] sm:$0xff]  ;;  %v1414_v36 = vld [vmem:[%s6958_s4 + $0x38] sm:$0xff] }
   0xc   :  { %4853 = vmatmul.mubr.msk.f32.gmra.mrb[2].mxu1 %vm68_vm0, %v51_v15  ;;  %v5618_v29 = vpack.c.bf16 %v1408_v27, %v1407_v26  ;;  %v1411_v32 = vld [vmem:[%s6958_s4 + $0x20] sm:$0xff]  ;;  %v5630_v37 = vpack.c.bf16 %v1414_v36, %v1413_v35  ;;  %v1416_v39 = vld [vmem:[%s6958_s4 + $0x48] sm:$0xff]  ;;  %v1417_v44 = vld [vmem:[%s6958_s4 + $0x50] sm:$0xff] }
   0xd   :  { %4855 = vmatprep.mubr.msk.f32.mxu1 %vm68_vm0, %v52_v16  ;;  %v5626_v34 = vpack.c.bf16 %v1412_v33, %v1411_v32  ;;  %v1415_v38 = vld [vmem:[%s6958_s4 + $0x40] sm:$0xff]  ;;  %v1418_v45 = vld [vmem:[%s6958_s4 + $0x58] sm:$0xff]  ;;  %v1420_v54 = vld [vmem:[%s6958_s4 + $0x68] sm:$0xff] }
   0xe   :  { %4834 = vmatmul.mubr.msk.f32.gmra.mrb[2].mxu0 %vm68_vm0, %v51_v15  ;;  %v5634_v42 = vpack.c.bf16 %v1416_v39, %v1415_v38  ;;  %v5638_v51 = vpack.c.bf16 %v1418_v45, %v1417_v44  ;;  %v1419_v53 = vld [vmem:[%s6958_s4 + $0x60] sm:$0xff]  ;;  %v4155_v13 = vld [vmem:[%s6956_s2 + $0x48] sm:$0xff]  ;;  %v4160_v26 = vld [vmem:[%s6956_s2 + $0x70] sm:$0xff] }
   0xf   :  { %4836 = vmatprep.mubr.msk.f32.mxu0 %vm68_vm0, %v52_v16  ;;  %v5642_v60 = vpack.c.bf16 %v1420_v54, %v1419_v53  ;;  %v60_v39 = vld [vmem:[%s6956_s2 + $0x10] sm:$0xff]  ;;  %v62_v44 = vld [vmem:[%s6956_s2 + $0x20] sm:$0xff]  ;;  %vm6451_vm6 = vmpackc.low %vm1698_vm4, %vm5965_vm5 }
  0x10   :  { %4856 = vmatmul.mubr.msk.f32.gmra.mrb[4].mxu1 %vm68_vm0, %v53_v17  ;;  %v4190_v54 = vld [vmem:[%s6956_s2 + $0x80] sm:$0xff]  ;;  %vm6648_vm9 = vmpackc.low %vm2114_vm8, %vm5965_vm5 }
  0x11   :  { %4858 = vmatprep.mubr.msk.f32.mxu1 %vm68_vm0, %v54_v18  ;;  %vm5868_vm13 = vmpackc.low %vm3019_vm12, %vm5965_vm5 }
  0x12   :  { %4837 = vmatmul.mubr.msk.f32.gmra.mrb[4].mxu0 %vm68_vm0, %v53_v17 }
  0x13   :  { %4839 = vmatprep.mubr.msk.f32.mxu0 %vm68_vm0, %v54_v18 }
  0x14   :  { %4859 = vmatmul.mubr.msk.f32.gmra.mrb[6].mxu1 %vm68_vm0, %v55_v19 }
  0x15   :  { %4861 = vmatprep.mubr.msk.f32.mxu1 %vm68_vm0, %v56_v20 }
  0x16   :  { %4840 = vmatmul.mubr.msk.f32.gmra.mrb[6].mxu0 %vm68_vm0, %v55_v19 }
  0x17   :  { %4842 = vmatprep.mubr.msk.f32.mxu0 %vm68_vm0, %v56_v20 }
  0x18   :  { %4862 = vmatmul.mubr.msk.f32.gmra.mrb[8].mxu1 %vm68_vm0, %v57_v21 }
  0x19   :  { %4932 = vmatprep.mubr.msk.f32.mxu1 %vm68_vm0, %v6054_v2 }
  0x1a   :  { %4843 = vmatmul.mubr.msk.f32.gmra.mrb[8].mxu0 %vm68_vm0, %v57_v21 }
  0x1b   :  { %4884 = vmatprep.mubr.msk.f32.mxu0 %vm341_vm1, %v4154_v25 }
  0x1c   :  { %4933 = vmatmul.mubr.msk.f32.vlgmr.msra.gmra.mrb[10].mxu1 %vm68_vm0, %v6069_v6 }
  0x1d   :  { %4935 = vmatprep.mubr.msk.f32.mxu1 %vm68_vm0, %v6074_v7  ;;  %5573 = vmatpush3.bf16.msra.mxu1 %v5570_v14 }
  0x1e   :  { %5595 = vmatprep.subr.bf16.mxu1 %v5594_v24 }
  0x20   :  { %4936 = vmatmul.mubr.msk.f32.gmra.mrb[12].mxu1 %vm68_vm0, %v51_v15 }
  0x21   :  { %4938 = vmatprep.mubr.msk.f32.mxu1 %vm68_vm0, %v52_v16 }
  0x24   :  { %4939 = vmatmul.mubr.msk.f32.gmra.mrb[14].mxu1 %vm68_vm0, %v53_v17 }
  0x25   :  { %4941 = vmatprep.mubr.msk.f32.mxu1 %vm68_vm0, %v54_v18 }
  0x28   :  { %4942 = vmatmul.mubr.msk.f32.gmra.mrb[16].mxu1 %vm68_vm0, %v55_v19 }
  0x29   :  { %4944 = vmatprep.mubr.msk.f32.mxu1 %vm68_vm0, %v56_v20 }
  0x2c   :  { %4945 = vmatmul.mubr.msk.f32.gmra.mrb[18].mxu1 %vm68_vm0, %v57_v21 }
  0x2d   :  { %4983 = vmatprep.mubr.msk.f32.mxu1 %vm68_vm0, %v6054_v2 }
  0x30   :  { %4984 = vmatmul.mubr.msk.f32.vlgmr.msra.gmra.mrb[20].mxu1 %vm68_vm0, %v6069_v6 }
  0x31   :  { %4986 = vmatprep.mubr.msk.f32.mxu1 %vm68_vm0, %v6074_v7  ;;  %5597 = vmatpush3.bf16.msra.mxu1 %v5594_v24  ;;  %v4159_v24 = vld [vmem:[%s6956_s2 + $0x68] sm:$0xff] }
  0x32   :  { %5619 = vmatprep.subr.bf16.mxu1 %v5618_v29 }
  0x34   :  { %4987 = vmatmul.mubr.msk.f32.gmra.mrb[22].mxu1 %vm68_vm0, %v51_v15 }
  0x35   :  { %4989 = vmatprep.mubr.msk.f32.mxu1 %vm68_vm0, %v52_v16 }
  0x38   :  { %4990 = vmatmul.mubr.msk.f32.gmra.mrb[24].mxu1 %vm68_vm0, %v53_v17 }
  0x39   :  { %4992 = vmatprep.mubr.msk.f32.mxu1 %vm68_vm0, %v54_v18 }
  0x3c   :  { %4993 = vmatmul.mubr.msk.f32.gmra.mrb[26].mxu1 %vm68_vm0, %v55_v19 }
  0x3d   :  { %4995 = vmatprep.mubr.msk.f32.mxu1 %vm68_vm0, %v56_v20 }
  0x40   :  { %4996 = vmatmul.mubr.msk.f32.gmra.mrb[28].mxu1 %vm68_vm0, %v57_v21 }
  0x41   :  { %5034 = vmatprep.mubr.msk.f32.mxu1 %vm68_vm0, %v6054_v2 }
  0x44   :  { %5035 = vmatmul.mubr.msk.f32.vlgmr.msra.gmra.mrb[30].mxu1 %vm68_vm0, %v6069_v6 }
  0x45   :  { %5037 = vmatprep.mubr.msk.f32.mxu1 %vm68_vm0, %v6074_v7  ;;  %5621 = vmatpush3.bf16.msra.mxu1 %v5618_v29  ;;  %v4161_v29 = vld [vmem:[%s6956_s2 + $0x78] sm:$0xf] }
  0x46   :  { %5623 = vmatprep.subr.bf16.mxu1 %v5622_v31 }
  0x48   :  { %5038 = vmatmul.mubr.msk.f32.gmra.mrb[32].mxu1 %vm68_vm0, %v51_v15 }
  0x49   :  { %5040 = vmatprep.mubr.msk.f32.mxu1 %vm68_vm0, %v52_v16  ;;  %5625 = vmatpush3.bf16.msra.mxu1 %v5622_v31  ;;  %v4156_v16 = vld [vmem:[%s6956_s2 + $0x50] sm:$0xff]  ;;  %v58_v31 = vld [vmem:[%s6956_s2] sm:$0xff] }
  0x4a   :  { %5627 = vmatprep.subr.bf16.mxu1 %v5626_v34 }
  0x4c   :  { %5041 = vmatmul.mubr.msk.f32.gmra.mrb[34].mxu1 %vm68_vm0, %v53_v17 }
  0x4d   :  { %5043 = vmatprep.mubr.msk.f32.mxu1 %vm68_vm0, %v54_v18  ;;  %5629 = vmatpush3.bf16.msra.mxu1 %v5626_v34 }
  0x4e   :  { %5631 = vmatprep.subr.bf16.mxu1 %v5630_v37 }
  0x50   :  { %5044 = vmatmul.mubr.msk.f32.gmra.mrb[36].mxu1 %vm68_vm0, %v55_v19  ;;  %v4157_v19 = vld [vmem:[%s6956_s2 + $0x58] sm:$0xff] }
  0x51   :  { %5046 = vmatprep.mubr.msk.f32.mxu1 %vm68_vm0, %v56_v20  ;;  %5633 = vmatpush3.bf16.msra.mxu1 %v5630_v37  ;;  %v59_v37 = vld [vmem:[%s6956_s2 + $0x8] sm:$0xff] }
  0x52   :  { %5635 = vmatprep.subr.bf16.mxu1 %v5634_v42 }
  0x54   :  { %5047 = vmatmul.mubr.msk.f32.gmra.mrb[38].mxu1 %vm68_vm0, %v57_v21  ;;  %v4158_v21 = vld [vmem:[%s6956_s2 + $0x60] sm:$0xff]  ;;  %vm3171_vm0 = vcmask 39936  }
  0x55   :  { %5637 = vmatpush3.bf16.msra.mxu1 %v5634_v42  ;;  %v61_v42 = vld [vmem:[%s6956_s2 + $0x18] sm:$0xff] }
  0x56   :  { %5639 = vmatprep.subr.bf16.mxu1 %v5638_v51 }
  0x59   :  { %5641 = vmatpush3.bf16.msra.mxu1 %v5638_v51 }
  0x5a   :  { %5643 = vmatprep.subr.bf16.mxu1 %v5642_v60 }
  0x5d   :  { %5645 = vmatpush3.bf16.msra.mxu1 %v5642_v60  ;;  %v4191_v60 = vld [vmem:[%s6956_s2 + $0x88] sm:$0xff] }
  0xdb   :  { %v4851_v40 = vpop.f32.mrb[0].mxu1 }
  0xdc   :  { %v292_v41 = vpop.f32.mrb[1].mxu1 }
  0xdd   :  { %v5506_v43 = vpack.c.bf16 %v4851_v40, %v292_v41  ;;  %v4832_v46 = vpop.f32.mrb[0].mxu0 }
  0xde   :  { %v165_v48 = vpop.f32.mrb[1].mxu0 }
  0xdf   :  { %v4854_v47 = vpop.f32.mrb[2].mxu1  ;;  %5507 = vmatprep.subr.bf16.mxu0 %v5506_v43  ;;  %v5526_v50 = vpack.c.bf16 %v4832_v46, %v165_v48 }
  0xe0   :  { %v302_v49 = vpop.f32.mrb[3].mxu1  ;;  %5509 = vmatpush3.bf16.msra.mxu0 %v5506_v43 }
  0xe1   :  { %v5510_v52 = vpack.c.bf16 %v4854_v47, %v302_v49  ;;  %v4835_v55 = vpop.f32.mrb[2].mxu0  ;;  %v63_v47 = vld [vmem:[%s6956_s2 + $0x28] sm:$0xff]  ;;  %v64_v49 = vld [vmem:[%s6956_s2 + $0x30] sm:$0xff] }
  0xe2   :  { %v175_v57 = vpop.f32.mrb[3].mxu0 }
  0xe3   :  { %v4857_v56 = vpop.f32.mrb[4].mxu1  ;;  %5511 = vmatprep.subr.bf16.mxu0 %v5510_v52  ;;  %v5530_v59 = vpack.c.bf16 %v4835_v55, %v175_v57 }
  0xe4   :  { %v312_v58 = vpop.f32.mrb[5].mxu1  ;;  %5513 = vmatpush3.bf16.msra.mxu0 %v5510_v52  ;;  %v65_v52 = vld [vmem:[%s6956_s2 + $0x38] sm:$0xf] }
  0xe5   :  { %v5514_v61 = vpack.c.bf16 %v4857_v56, %v312_v58  ;;  %v4838_v62 = vpop.f32.mrb[4].mxu0 }
  0xe6   :  { %v185_v0 = vpop.f32.mrb[5].mxu0 }
  0xe7   :  { %v4860_v63 = vpop.f32.mrb[6].mxu1  ;;  %5515 = vmatprep.subr.bf16.mxu0 %v5514_v61  ;;  %v5534_v2 = vpack.c.bf16 %v4838_v62, %v185_v0  ;;  %v4192_v62 = vld [vmem:[%s6956_s2 + $0x90] sm:$0xff] }
  0xe8   :  { %v322_v1 = vpop.f32.mrb[7].mxu1  ;;  %5517 = vmatpush3.bf16.msra.mxu0 %v5514_v61 }
  0xe9   :  { %v5518_v3 = vpack.c.bf16 %v4860_v63, %v322_v1  ;;  %v4841_v4 = vpop.f32.mrb[6].mxu0  ;;  %v4193_v1 = vld [vmem:[%s6956_s2 + $0x98] sm:$0xff] }
  0xea   :  { %v195_v6 = vpop.f32.mrb[7].mxu0 }
  0xeb   :  { %v4863_v5 = vpop.f32.mrb[8].mxu1  ;;  %5519 = vmatprep.subr.bf16.mxu0 %v5518_v3  ;;  %v5538_v8 = vpack.c.bf16 %v4841_v4, %v195_v6  ;;  %v4195_v6 = vld [vmem:[%s6956_s2 + $0xa8] sm:$0xff] }
  0xec   :  { %v332_v7 = vpop.f32.mrb[9].mxu1  ;;  %5521 = vmatpush3.bf16.msra.mxu0 %v5518_v3  ;;  %v4194_v3 = vld [vmem:[%s6956_s2 + $0xa0] sm:$0xff] }
  0xed   :  { %v5522_v9 = vpack.c.bf16 %v4863_v5, %v332_v7  ;;  %v4844_v10 = vpop.f32.mrb[8].mxu0 }
  0xee   :  { %v205_v11 = vpop.f32.mrb[9].mxu0 }
  0xef   :  { %5523 = vmatprep.subr.bf16.mxu0 %v5522_v9  ;;  %v4934_v12 = vpop.f32.mrb[10].mxu1  ;;  %v5542_v14 = vpack.c.bf16 %v4844_v10, %v205_v11  ;;  %v4197_v11 = vld [vmem:[%s6956_s2 + $0xb8] sm:$0xf] }
  0xf0   :  { %5525 = vmatpush3.bf16.msra.mxu0 %v5522_v9  ;;  %v678_v15 = vpop.f32.mrb[11].mxu1 }
  0xf1   :  { %5527 = vmatprep.subr.bf16.mxu0 %v5526_v50  ;;  %v5550_v17 = vpack.c.bf16 %v4934_v12, %v678_v15 }
  0xf3   :  { %4885 = vmatmul.mubr.msk.f32.vlgmr.msra.gmra.mrb[10].mxu0 %vm341_vm1, %v4155_v13  ;;  %v4937_v18 = vpop.f32.mrb[12].mxu1  ;;  %v4218_v13 = vld [vmem:[%s6956_s2 + $0xc0] sm:$0xff] }
  0xf4   :  { %5529 = vmatpush3.bf16.msra.mxu0 %v5526_v50  ;;  %4887 = vmatprep.mubr.msk.f32.mxu0 %vm341_vm1, %v4156_v16  ;;  %v688_v20 = vpop.f32.mrb[13].mxu1 }
  0xf5   :  { %5531 = vmatprep.subr.bf16.mxu0 %v5530_v59  ;;  %v5554_v22 = vpack.c.bf16 %v4937_v18, %v688_v20  ;;  %v4219_v18 = vld [vmem:[%s6956_s2 + $0xc8] sm:$0xff]  ;;  %v4221_v20 = vld [vmem:[%s6956_s2 + $0xd8] sm:$0xff] }
  0xf7   :  { %4888 = vmatmul.mubr.msk.f32.gmra.mrb[12].mxu0 %vm341_vm1, %v4157_v19  ;;  %v4940_v23 = vpop.f32.mrb[14].mxu1  ;;  %v4220_v19 = vld [vmem:[%s6956_s2 + $0xd0] sm:$0xff] }
  0xf8   :  { %5533 = vmatpush3.bf16.msra.mxu0 %v5530_v59  ;;  %4890 = vmatprep.mubr.msk.f32.mxu0 %vm341_vm1, %v4158_v21  ;;  %v698_v25 = vpop.f32.mrb[15].mxu1  ;;  %v4222_v21 = vld [vmem:[%s6956_s2 + $0xe0] sm:$0xff] }
  0xf9   :  { %5535 = vmatprep.subr.bf16.mxu0 %v5534_v2  ;;  %v5558_v27 = vpack.c.bf16 %v4940_v23, %v698_v25  ;;  %v4224_v23 = vld [vmem:[%s6956_s2 + $0xf0] sm:$0xff]  ;;  %v4246_v25 = vld [vmem:[%s6956_s2 + $0x100] sm:$0xff] }
  0xfb   :  { %4891 = vmatmul.mubr.msk.f32.gmra.mrb[14].mxu0 %vm341_vm1, %v4159_v24  ;;  %v4943_v28 = vpop.f32.mrb[16].mxu1  ;;  %v4225_v24 = vld [vmem:[%s6956_s2 + $0xf8] sm:$0xf] }
  0xfc   :  { %5537 = vmatpush3.bf16.msra.mxu0 %v5534_v2  ;;  %4893 = vmatprep.mubr.msk.f32.mxu0 %vm341_vm1, %v4160_v26  ;;  %v708_v30 = vpop.f32.mrb[17].mxu1  ;;  %v4247_v26 = vld [vmem:[%s6956_s2 + $0x108] sm:$0xff] }
  0xfd   :  { %5539 = vmatprep.subr.bf16.mxu0 %v5538_v8  ;;  %v5562_v32 = vpack.c.bf16 %v4943_v28, %v708_v30  ;;  %v4249_v28 = vld [vmem:[%s6956_s2 + $0x118] sm:$0xff]  ;;  %v4251_v30 = vld [vmem:[%s6956_s2 + $0x128] sm:$0xff] }
  0xff   :  { %4894 = vmatmul.mubr.msk.f32.gmra.mrb[16].mxu0 %vm341_vm1, %v4161_v29  ;;  %v4946_v33 = vpop.f32.mrb[18].mxu1  ;;  %v4250_v29 = vld [vmem:[%s6956_s2 + $0x120] sm:$0xff] }
 0x100   :  { %5541 = vmatpush3.bf16.msra.mxu0 %v5538_v8  ;;  %4916 = vmatprep.mubr.msk.f32.mxu0 %vm341_vm1, %v58_v31  ;;  %v718_v34 = vpop.f32.mrb[19].mxu1  ;;  %v4196_v8 = vld [vmem:[%s6956_s2 + $0xb0] sm:$0xff] }
 0x101   :  { %5543 = vmatprep.subr.bf16.mxu0 %v5542_v14  ;;  %v5566_v35 = vpack.c.bf16 %v4946_v33, %v718_v34  ;;  %v4252_v31 = vld [vmem:[%s6956_s2 + $0x130] sm:$0xff]  ;;  %v4283_v34 = vld [vmem:[%s6958_s4 + $0x78] sm:$0xff] }
 0x102   :  { %v1421_v33 = vld [vmem:[%s6958_s4 + $0x70] sm:$0xff] }
 0x103   :  { %v4985_v36 = vpop.f32.mrb[20].mxu1  ;;  %5109 = vmatprep.subr.mxu1 %v1421_v33 }
 0x104   :  { %5545 = vmatpush3.bf16.msra.mxu0 %v5542_v14  ;;  %v942_v38 = vpop.f32.mrb[21].mxu1  ;;  %5110 = vmatpush3.msra.mxu1 %v1421_v33 }
 0x105   :  { %5551 = vmatprep.subr.bf16.mxu0 %v5550_v17  ;;  %v5574_v40 = vpack.c.bf16 %v4985_v36, %v942_v38 }
 0x107   :  { %4917 = vmatmul.mubr.msk.f32.vlgmr.msra.gmra.mrb[10].mxu0 %vm341_vm1, %v59_v37  ;;  %v4988_v41 = vpop.f32.mrb[22].mxu1  ;;  %v4274_v37 = vld [vmem:[%s6957_s3] ss:$0 sm:$0xff] }
 0x108   :  { %5553 = vmatpush3.bf16.msra.mxu0 %v5550_v17  ;;  %4919 = vmatprep.mubr.msk.f32.mxu0 %vm341_vm1, %v60_v39  ;;  %v952_v43 = vpop.f32.mrb[23].mxu1  ;;  %v4285_v39 = vld [vmem:[%s6958_s4 + $0x88] sm:$0xff] }
 0x109   :  { %5555 = vmatprep.subr.bf16.mxu0 %v5554_v22  ;;  %v5578_v45 = vpack.c.bf16 %v4988_v41, %v952_v43 }
 0x10b   :  { %4920 = vmatmul.mubr.msk.f32.gmra.mrb[12].mxu0 %vm341_vm1, %v61_v42  ;;  %v4991_v46 = vpop.f32.mrb[24].mxu1 }
 0x10c   :  { %5557 = vmatpush3.bf16.msra.mxu0 %v5554_v22  ;;  %4922 = vmatprep.mubr.msk.f32.mxu0 %vm341_vm1, %v62_v44  ;;  %v962_v48 = vpop.f32.mrb[25].mxu1  ;;  %v4223_v22 = vld [vmem:[%s6956_s2 + $0xe8] sm:$0xff] }
 0x10d   :  { %5559 = vmatprep.subr.bf16.mxu0 %v5558_v27  ;;  %v5582_v50 = vpack.c.bf16 %v4991_v46, %v962_v48  ;;  %v4287_v46 = vld [vmem:[%s6958_s4 + $0x98] sm:$0xff] }
 0x10f   :  { %4923 = vmatmul.mubr.msk.f32.gmra.mrb[14].mxu0 %vm341_vm1, %v63_v47  ;;  %v4994_v51 = vpop.f32.mrb[26].mxu1  ;;  %v4288_v47 = vld [vmem:[%s6958_s4 + $0xa0] sm:$0xff] }
 0x110   :  { %5561 = vmatpush3.bf16.msra.mxu0 %v5558_v27  ;;  %4925 = vmatprep.mubr.msk.f32.mxu0 %vm341_vm1, %v64_v49  ;;  %v972_v53 = vpop.f32.mrb[27].mxu1  ;;  %v4248_v27 = vld [vmem:[%s6956_s2 + $0x110] sm:$0xff] }
 0x111   :  { %5563 = vmatprep.subr.bf16.mxu0 %v5562_v32  ;;  %v5586_v55 = vpack.c.bf16 %v4994_v51, %v972_v53  ;;  %v5654_v51 = vpack.c.bf16 %v4288_v47, %v4287_v46  ;;  %v4289_v53 = vld [vmem:[%s6958_s4 + $0xa8] sm:$0xff]  ;;  %v4327_v46 = vld [vmem:[%s6960_s6 + $0x40] sm:$0xff] }
 0x112   :  { %v4328_v47 = vld [vmem:[%s6960_s6 + $0x48] sm:$0xff] }
 0x113   :  { %4926 = vmatmul.mubr.msk.f32.gmra.mrb[16].mxu0 %vm341_vm1, %v65_v52  ;;  %v4997_v56 = vpop.f32.mrb[28].mxu1 }
 0x114   :  { %5565 = vmatpush3.bf16.msra.mxu0 %v5562_v32  ;;  %4967 = vmatprep.mubr.msk.f32.mxu0 %vm341_vm1, %v4190_v54  ;;  %v982_v57 = vpop.f32.mrb[29].mxu1  ;;  %v4253_v32 = vld [vmem:[%s6956_s2 + $0x138] sm:$0xf]  ;;  %v4290_v54 = vld [vmem:[%s6958_s4 + $0xb0] sm:$0xff] }
 0x115   :  { %5567 = vmatprep.subr.bf16.mxu0 %v5566_v35  ;;  %v5590_v58 = vpack.c.bf16 %v4997_v56, %v982_v57 }
 0x117   :  { %v5036_v59 = vpop.f32.mrb[30].mxu1 }
 0x118   :  { %5569 = vmatpush3.bf16.msra.mxu0 %v5566_v35  ;;  %v1206_v61 = vpop.f32.mrb[31].mxu1  ;;  %v4284_v35 = vld [vmem:[%s6958_s4 + $0x80] sm:$0xff] }
 0x119   :  { %5575 = vmatprep.subr.bf16.mxu0 %v5574_v40  ;;  %v5598_v63 = vpack.c.bf16 %v5036_v59, %v1206_v61  ;;  %v5646_v36 = vpack.c.bf16 %v4284_v35, %v4283_v34  ;;  %v4292_v61 = vld [vmem:[%s6958_s4 + $0xc0] sm:$0xff] }
 0x11b   :  { %4968 = vmatmul.mubr.msk.f32.vlgmr.msra.gmra.mrb[10].mxu0 %vm341_vm1, %v4191_v60  ;;  %v5039_v0 = vpop.f32.mrb[32].mxu1  ;;  %5647 = vmatprep.subr.bf16.mxu1 %v5646_v36  ;;  %v4291_v60 = vld [vmem:[%s6958_s4 + $0xb8] sm:$0xff] }
 0x11c   :  { %5577 = vmatpush3.bf16.msra.mxu0 %v5574_v40  ;;  %4970 = vmatprep.mubr.msk.f32.mxu0 %vm341_vm1, %v4192_v62  ;;  %v1216_v2 = vpop.f32.mrb[33].mxu1  ;;  %v4286_v40 = vld [vmem:[%s6958_s4 + $0x90] sm:$0xff] }
 0x11d   :  { %5579 = vmatprep.subr.bf16.mxu0 %v5578_v45  ;;  %v5602_v4 = vpack.c.bf16 %v5039_v0, %v1216_v2  ;;  %v5650_v44 = vpack.c.bf16 %v4286_v40, %v4285_v39  ;;  %v4293_v2 = vld [vmem:[%s6958_s4 + $0xc8] sm:$0xff]  ;;  %v1683_v40 = vld [vmem:[%s6959_s5 + $0x10] sm:$0xff] }
 0x11e   :  { %v1682_v39 = vld [vmem:[%s6959_s5 + $0x8] sm:$0xff] }
 0x11f   :  { %4971 = vmatmul.mubr.msk.f32.gmra.mrb[12].mxu0 %vm341_vm1, %v4193_v1  ;;  %v5042_v5 = vpop.f32.mrb[34].mxu1  ;;  %v5662_v1 = vpack.c.bf16 %v4292_v61, %v4291_v60  ;;  %v1903_v60 = vld [vmem:[%s6960_s6 + $0x20] sm:$0xff] }
 0x120   :  { %5581 = vmatpush3.bf16.msra.mxu0 %v5578_v45  ;;  %4973 = vmatprep.mubr.msk.f32.mxu0 %vm341_vm1, %v4194_v3  ;;  %v1226_v7 = vpop.f32.mrb[35].mxu1  ;;  %v4294_v3 = vld [vmem:[%s6958_s4 + $0xd0] sm:$0xff] }
 0x121   :  { %5583 = vmatprep.subr.bf16.mxu0 %v5582_v50  ;;  %v5606_v9 = vpack.c.bf16 %v5042_v5, %v1226_v7  ;;  %v4295_v5 = vld [vmem:[%s6958_s4 + $0xd8] sm:$0xff] }
 0x123   :  { %4974 = vmatmul.mubr.msk.f32.gmra.mrb[14].mxu0 %vm341_vm1, %v4195_v6  ;;  %v5045_v10 = vpop.f32.mrb[36].mxu1  ;;  %v4296_v6 = vld [vmem:[%s6958_s4 + $0xe0] sm:$0xff] }
 0x124   :  { %5585 = vmatpush3.bf16.msra.mxu0 %v5582_v50  ;;  %4976 = vmatprep.mubr.msk.f32.mxu0 %vm341_vm1, %v4196_v8  ;;  %v1236_v12 = vpop.f32.mrb[37].mxu1  ;;  %v5670_v7 = vpack.c.bf16 %v4296_v6, %v4295_v5  ;;  %v4297_v8 = vld [vmem:[%s6958_s4 + $0xe8] sm:$0xff]  ;;  %v4348_v6 = vld [vmem:[%s6960_s6 + $0x80] sm:$0xff] }
 0x125   :  { %5587 = vmatprep.subr.bf16.mxu0 %v5586_v55  ;;  %v5610_v14 = vpack.c.bf16 %v5045_v10, %v1236_v12 }
 0x127   :  { %4977 = vmatmul.mubr.msk.f32.gmra.mrb[16].mxu0 %vm341_vm1, %v4197_v11  ;;  %v5048_v15 = vpop.f32.mrb[38].mxu1 }
 0x128   :  { %5589 = vmatpush3.bf16.msra.mxu0 %v5586_v55  ;;  %5018 = vmatprep.mubr.msk.f32.mxu0 %vm341_vm1, %v4218_v13  ;;  %v1246_v16 = vpop.f32.mrb[39].mxu1 }
 0x129   :  { %5591 = vmatprep.subr.bf16.mxu0 %v5590_v58  ;;  %v5614_v17 = vpack.c.bf16 %v5048_v15, %v1246_v16 }
 0x12c   :  { %5593 = vmatpush3.bf16.msra.mxu0 %v5590_v58  ;;  %v5658_v58 = vpack.c.bf16 %v4290_v54, %v4289_v53 }
 0x12d   :  { %5599 = vmatprep.subr.bf16.mxu0 %v5598_v63 }
 0x12f   :  { %5019 = vmatmul.mubr.msk.f32.vlgmr.msra.gmra.mrb[10].mxu0 %vm341_vm1, %v4219_v18 }
 0x130   :  { %5601 = vmatpush3.bf16.msra.mxu0 %v5598_v63  ;;  %5021 = vmatprep.mubr.msk.f32.mxu0 %vm341_vm1, %v4220_v19 }
 0x131   :  { %5603 = vmatprep.subr.bf16.mxu0 %v5602_v4 }
 0x133   :  { %5022 = vmatmul.mubr.msk.f32.gmra.mrb[12].mxu0 %vm341_vm1, %v4221_v20 }
 0x134   :  { %5605 = vmatpush3.bf16.msra.mxu0 %v5602_v4  ;;  %5024 = vmatprep.mubr.msk.f32.mxu0 %vm341_vm1, %v4222_v21  ;;  %v5666_v4 = vpack.c.bf16 %v4294_v3, %v4293_v2  ;;  %v1905_v3 = vld [vmem:[%s6960_s6 + $0x30] sm:$0xff] }
 0x135   :  { %5607 = vmatprep.subr.bf16.mxu0 %v5606_v9 }
 0x137   :  { %5025 = vmatmul.mubr.msk.f32.gmra.mrb[14].mxu0 %vm341_vm1, %v4223_v22 }
 0x138   :  { %5609 = vmatpush3.bf16.msra.mxu0 %v5606_v9  ;;  %5027 = vmatprep.mubr.msk.f32.mxu0 %vm341_vm1, %v4224_v23  ;;  %v1681_v9 = vld [vmem:[%s6959_s5] sm:$0xff] }
 0x139   :  { %5611 = vmatprep.subr.bf16.mxu0 %v5610_v14 }
 0x13b   :  { %5028 = vmatmul.mubr.msk.f32.gmra.mrb[16].mxu0 %vm341_vm1, %v4225_v24 }
 0x13c   :  { %5613 = vmatpush3.bf16.msra.mxu0 %v5610_v14  ;;  %5069 = vmatprep.mubr.msk.f32.mxu0 %vm341_vm1, %v4246_v25 }
 0x13d   :  { %5615 = vmatprep.subr.bf16.mxu0 %v5614_v17 }
 0x140   :  { %5617 = vmatpush3.bf16.msra.mxu0 %v5614_v17 }
 0x143   :  { %5070 = vmatmul.mubr.msk.f32.vlgmr.msra.gmra.mrb[10].mxu0 %vm341_vm1, %v4247_v26 }
 0x144   :  { %5072 = vmatprep.mubr.msk.f32.mxu0 %vm341_vm1, %v4248_v27 }
 0x147   :  { %5073 = vmatmul.mubr.msk.f32.gmra.mrb[12].mxu0 %vm341_vm1, %v4249_v28 }
 0x148   :  { %5075 = vmatprep.mubr.msk.f32.mxu0 %vm341_vm1, %v4250_v29 }
 0x14b   :  { %5076 = vmatmul.mubr.msk.f32.gmra.mrb[14].mxu0 %vm341_vm1, %v4251_v30 }
 0x14c   :  { %5078 = vmatprep.mubr.msk.f32.mxu0 %vm341_vm1, %v4252_v31 }
 0x14f   :  { %5079 = vmatmul.mubr.msk.f32.gmra.mrb[16].mxu0 %vm341_vm1, %v4253_v32  ;;  %vm3331_vm1 = vcmask 162816  }
 0x150   :  { %5181 = vmatprep.mubr.msk.f32.mxu0 %vm1685_vm3, %v1681_v9 }
 0x216   :  { %v5071_v38 = vpop.f32.mrb[10].mxu0 }
 0x217   :  { %v1345_v41 = vpop.f32.mrb[11].mxu0  ;;  %v1400_v43 = vadd.f32 %v5071_v38, %v4274_v37 }
 0x218   :  { %v1399_v42 = vadd.f32 %v4274_v37, %v1345_v41  ;;  %v1684_v41 = vld [vmem:[%s6959_s5 + $0x18] sm:$0x3f] }
 0x21a   :  { %v5074_v45 = vpop.f32.mrb[12].mxu0  ;;  %5111 = vmatprep.mubr.msk.f32.mxu1 %vm1422_vm2, %v1399_v42 }
 0x21b   :  { %v1355_v48 = vpop.f32.mrb[13].mxu0  ;;  %5112 = vmatmul.mubr.msk.f32.vlgmr.msra.gmra.mrb[40].mxu1 %vm1422_vm2, %v1400_v43  ;;  %v1402_v50 = vadd.f32 %v5074_v45, %v4274_v37  ;;  %v4314_v45 = vld [vmem:[%s6959_s5 + $0x38] sm:$0x3f] }
 0x21c   :  { %v1401_v49 = vadd.f32 %v4274_v37, %v1355_v48  ;;  %5649 = vmatpush3.bf16.msra.mxu1 %v5646_v36  ;;  %v1899_v48 = vld [vmem:[%s6960_s6] sm:$0xff] }
 0x21d   :  { %5651 = vmatprep.subr.bf16.mxu1 %v5650_v44 }
 0x21e   :  { %v5077_v52 = vpop.f32.mrb[14].mxu0  ;;  %5114 = vmatprep.mubr.msk.f32.mxu1 %vm1422_vm2, %v1401_v49 }
 0x21f   :  { %v1365_v55 = vpop.f32.mrb[15].mxu0  ;;  %5115 = vmatmul.mubr.msk.f32.gmra.mrb[42].mxu1 %vm1422_vm2, %v1402_v50  ;;  %v1404_v57 = vadd.f32 %v5077_v52, %v4274_v37  ;;  %v4330_v52 = vld [vmem:[%s6960_s6 + $0x58] sm:$0xff] }
 0x220   :  { %v1403_v56 = vadd.f32 %v4274_v37, %v1365_v55  ;;  %5653 = vmatpush3.bf16.msra.mxu1 %v5650_v44  ;;  %v4313_v44 = vld [vmem:[%s6959_s5 + $0x30] sm:$0xff] }
 0x221   :  { %5655 = vmatprep.subr.bf16.mxu1 %v5654_v51  ;;  %v1901_v55 = vld [vmem:[%s6960_s6 + $0x10] sm:$0xff] }
 0x222   :  { %v5080_v59 = vpop.f32.mrb[16].mxu0  ;;  %5117 = vmatprep.mubr.msk.f32.mxu1 %vm1422_vm2, %v1403_v56 }
 0x223   :  { %v1375_v62 = vpop.f32.mrb[17].mxu0  ;;  %5118 = vmatmul.mubr.msk.f32.gmra.mrb[44].mxu1 %vm1422_vm2, %v1404_v57  ;;  %v1406_v0 = vadd.f32 %v5080_v59, %v4274_v37  ;;  %v4332_v59 = vld [vmem:[%s6960_s6 + $0x68] sm:$0xff] }
 0x224   :  { %v1405_v63 = vadd.f32 %v4274_v37, %v1375_v62  ;;  %5657 = vmatpush3.bf16.msra.mxu1 %v5654_v51  ;;  %v4329_v51 = vld [vmem:[%s6960_s6 + $0x50] sm:$0xff]  ;;  %v1904_v62 = vld [vmem:[%s6960_s6 + $0x28] sm:$0xff]  ;;  %v2844_v37 = vld [vmem:[%s6963_s9] sm:$0xff] }
 0x225   :  { %5659 = vmatprep.subr.bf16.mxu1 %v5658_v58  ;;  %v5732_v54 = vpack.c.bf16 %v4330_v52, %v4329_v51 }
 0x226   :  { %5120 = vmatprep.mubr.msk.f32.mxu1 %vm1422_vm2, %v1405_v63 }
 0x227   :  { %5121 = vmatmul.mubr.msk.f32.gmra.mrb[46].mxu1 %vm1422_vm2, %v1406_v0 }
 0x228   :  { %5661 = vmatpush3.bf16.msra.mxu1 %v5658_v58  ;;  %5153 = vmatprep.mubr.msk.f32.mxu1 %vm1422_vm2, %v1399_v42  ;;  %v4311_v42 = vld [vmem:[%s6959_s5 + $0x20] sm:$0xff] }
 0x229   :  { %5663 = vmatprep.subr.bf16.mxu1 %v5662_v1  ;;  %v4331_v58 = vld [vmem:[%s6960_s6 + $0x60] sm:$0xff] }
 0x22a   :  { %v5736_v61 = vpack.c.bf16 %v4332_v59, %v4331_v58 }
 0x22c   :  { %5665 = vmatpush3.bf16.msra.mxu1 %v5662_v1  ;;  %v4334_v1 = vld [vmem:[%s6960_s6 + $0x78] sm:$0xf] }
 0x22d   :  { %5667 = vmatprep.subr.bf16.mxu1 %v5666_v4 }
 0x230   :  { %5669 = vmatpush3.bf16.msra.mxu1 %v5666_v4  ;;  %v1906_v4 = vld [vmem:[%s6960_s6 + $0x38] sm:$0xf] }
 0x231   :  { %5671 = vmatprep.subr.bf16.mxu1 %v5670_v7  ;;  %v5722_v5 = vpack.c.bf16 %v1906_v4, %v1905_v3  ;;  %v4346_v3 = vld [vmem:[%s6961_s7 + $0x20] sm:$0xff] }
 0x232   :  { %v4366_v4 = vld [vmem:[%s6960_s6 + $0xc0] sm:$0xff] }
 0x234   :  { %5673 = vmatpush3.bf16.msra.mxu1 %v5670_v7  ;;  %v4349_v7 = vld [vmem:[%s6960_s6 + $0x88] sm:$0xff] }
 0x235   :  { %5151 = vmatprep.subr.mxu1 %v4297_v8 }
 0x238   :  { %5152 = vmatpush3.msra.mxu1 %v4297_v8  ;;  %v5766_v8 = vpack.c.bf16 %v4349_v7, %v4348_v6 }
 0x239   :  { %5154 = vmatmul.mubr.msk.f32.vlgmr.msra.gmra.mrb[48].mxu1 %vm1422_vm2, %v1400_v43  ;;  %v4312_v43 = vld [vmem:[%s6959_s5 + $0x28] sm:$0xff] }
 0x23a   :  { %5156 = vmatprep.mubr.msk.f32.mxu1 %vm1422_vm2, %v1401_v49  ;;  %v5728_v49 = vpack.c.bf16 %v4328_v47, %v4327_v46  ;;  %v4325_v47 = vld [vmem:[%s6961_s7 + $0x10] sm:$0xff] }
 0x23d   :  { %5157 = vmatmul.mubr.msk.f32.gmra.mrb[50].mxu1 %vm1422_vm2, %v1402_v50  ;;  %v1900_v50 = vld [vmem:[%s6960_s6 + $0x8] sm:$0xff] }
 0x23e   :  { %5159 = vmatprep.mubr.msk.f32.mxu1 %vm1422_vm2, %v1403_v56  ;;  %v5710_v53 = vpack.c.bf16 %v1900_v50, %v1899_v48  ;;  %v1902_v56 = vld [vmem:[%s6960_s6 + $0x18] sm:$0xff] }
 0x240   :  { %5711 = vmatprep.subr.bf16.mxu1 %v5710_v53 }
 0x241   :  { %5160 = vmatmul.mubr.msk.f32.gmra.mrb[52].mxu1 %vm1422_vm2, %v1404_v57  ;;  %v5714_v57 = vpack.c.bf16 %v1902_v56, %v1901_v55 }
 0x242   :  { %5162 = vmatprep.mubr.msk.f32.mxu1 %vm1422_vm2, %v1405_v63  ;;  %5713 = vmatpush3.bf16.msra.mxu1 %v5710_v53  ;;  %v5718_v63 = vpack.c.bf16 %v1904_v62, %v1903_v60  ;;  %v1897_v62 = vld [vmem:[%s6961_s7] sm:$0xff] }
 0x243   :  { %5715 = vmatprep.subr.bf16.mxu1 %v5714_v57 }
 0x245   :  { %5163 = vmatmul.mubr.msk.f32.gmra.mrb[54].mxu1 %vm1422_vm2, %v1406_v0  ;;  %v4333_v0 = vld [vmem:[%s6960_s6 + $0x70] sm:$0xff]  ;;  %vm4116_vm2 = vcmask 74752  }
 0x246   :  { %5717 = vmatpush3.bf16.msra.mxu1 %v5714_v57  ;;  %v5740_v2 = vpack.c.bf16 %v4334_v1, %v4333_v0  ;;  %v1898_v1 = vld [vmem:[%s6961_s7 + $0x8] sm:$0x3] }
 0x247   :  { %5719 = vmatprep.subr.bf16.mxu1 %v5718_v63 }
 0x24a   :  { %5721 = vmatpush3.bf16.msra.mxu1 %v5718_v63 }
 0x24b   :  { %5724 = vmatprep.subr.msk.bf16.mxu1 %vm6451_vm6, %v5722_v5 }
 0x24e   :  { %5727 = vmatpush3.bf16.msk.msra.mxu1 %vm6451_vm6, %v5722_v5  ;;  %v4367_v5 = vld [vmem:[%s6960_s6 + $0xc8] sm:$0xff] }
 0x2ee   :  { %v5113_v10 = vpop.f32.mrb[40].mxu1 }
 0x2ef   :  { %v1513_v11 = vpop.f32.mrb[41].mxu1 }
 0x2f2   :  { %v5116_v12 = vpop.f32.mrb[42].mxu1 }
 0x2f3   :  { %v1523_v13 = vpop.f32.mrb[43].mxu1 }
 0x2f6   :  { %v5119_v14 = vpop.f32.mrb[44].mxu1 }
 0x2f7   :  { %v1533_v15 = vpop.f32.mrb[45].mxu1 }
 0x2fa   :  { %v5122_v16 = vpop.f32.mrb[46].mxu1 }
 0x2fb   :  { %v1543_v17 = vpop.f32.mrb[47].mxu1 }
 0x30c   :  { %v5155_v18 = vpop.f32.mrb[48].mxu1 }
 0x30d   :  { %v1674_v19 = vmax.f32 %v5113_v10, %v5155_v18  ;;  %v1634_v20 = vpop.f32.mrb[49].mxu1  ;;  %v4351_v18 = vld [vmem:[%s6960_s6 + $0x98] sm:$0xff] }
 0x30e   :  { %v1673_v21 = vmax.f32 %v1513_v11, %v1634_v20 }
 0x310   :  { %v5674_v22 = vpack.c.bf16 %v1674_v19, %v1673_v21  ;;  %v5158_v23 = vpop.f32.mrb[50].mxu1 }
 0x311   :  { %v1676_v24 = vmax.f32 %v5116_v12, %v5158_v23  ;;  %v1644_v25 = vpop.f32.mrb[51].mxu1 }
 0x312   :  { %v1675_v26 = vmax.f32 %v1523_v13, %v1644_v25  ;;  %5675 = vmatprep.subr.bf16.mxu0 %v5674_v22 }
 0x313   :  { %5677 = vmatpush3.bf16.msra.mxu0 %v5674_v22 }
 0x314   :  { %v5678_v27 = vpack.c.bf16 %v1676_v24, %v1675_v26  ;;  %v5161_v28 = vpop.f32.mrb[52].mxu1  ;;  %v4352_v26 = vld [vmem:[%s6960_s6 + $0xa0] sm:$0xff] }
 0x315   :  { %v1678_v29 = vmax.f32 %v5119_v14, %v5161_v28  ;;  %v1654_v30 = vpop.f32.mrb[53].mxu1 }
 0x316   :  { %v1677_v31 = vmax.f32 %v1533_v15, %v1654_v30  ;;  %5679 = vmatprep.subr.bf16.mxu0 %v5678_v27 }
 0x317   :  { %5681 = vmatpush3.bf16.msra.mxu0 %v5678_v27 }
 0x318   :  { %v5682_v32 = vpack.c.bf16 %v1678_v29, %v1677_v31  ;;  %v5164_v33 = vpop.f32.mrb[54].mxu1  ;;  %v4354_v31 = vld [vmem:[%s6960_s6 + $0xb0] sm:$0xff] }
 0x319   :  { %v1680_v34 = vmax.f32 %v5122_v16, %v5164_v33  ;;  %v1664_v35 = vpop.f32.mrb[55].mxu1 }
 0x31a   :  { %v1679_v36 = vmax.f32 %v1543_v17, %v1664_v35  ;;  %5683 = vmatprep.subr.bf16.mxu0 %v5682_v32  ;;  %v4350_v17 = vld [vmem:[%s6960_s6 + $0x90] sm:$0xff]  ;;  %v4385_v35 = vld [vmem:[%s6960_s6 + $0x108] sm:$0xff] }
 0x31b   :  { %5685 = vmatpush3.bf16.msra.mxu0 %v5682_v32  ;;  %v5770_v24 = vpack.c.bf16 %v4351_v18, %v4350_v17  ;;  %v4372_v17 = vld [vmem:[%s6960_s6 + $0xf0] sm:$0xff]  ;;  %v4373_v18 = vld [vmem:[%s6960_s6 + $0xf8] sm:$0xf] }
 0x31c   :  { %v5686_v38 = vpack.c.bf16 %v1680_v34, %v1679_v36  ;;  %v4384_v34 = vld [vmem:[%s6960_s6 + $0x100] sm:$0xff] }
 0x31d   :  { %v5822_v36 = vpack.c.bf16 %v4385_v35, %v4384_v34 }
 0x31e   :  { %5688 = vmatprep.subr.msk.bf16.mxu0 %vm6451_vm6, %v5686_v38 }
 0x31f   :  { %5691 = vmatpush3.bf16.msk.msra.mxu0 %vm6451_vm6, %v5686_v38 }
 0x320   :  { %5693 = vmatprep.subr.bf16.mxu0 %v5674_v22 }
 0x322   :  { %5182 = vmatmul.mubr.msk.f32.vlgmr.msra.gmra.mrb[18].mxu0 %vm1685_vm3, %v1682_v39  ;;  %v4387_v39 = vld [vmem:[%s6960_s6 + $0x118] sm:$0xff] }
 0x323   :  { %5695 = vmatpush3.bf16.msra.mxu0 %v5674_v22  ;;  %5184 = vmatprep.mubr.msk.f32.mxu0 %vm1685_vm3, %v1683_v40 }
 0x324   :  { %5697 = vmatprep.subr.bf16.mxu0 %v5678_v27 }
 0x326   :  { %5185 = vmatmul.mubr.msk.f32.gmra.mrb[20].mxu0 %vm1685_vm3, %v1684_v41  ;;  %v4388_v41 = vld [vmem:[%s6960_s6 + $0x120] sm:$0xff] }
 0x327   :  { %5699 = vmatpush3.bf16.msra.mxu0 %v5678_v27  ;;  %5203 = vmatprep.mubr.msk.f32.mxu0 %vm1685_vm3, %v4311_v42  ;;  %v4353_v27 = vld [vmem:[%s6960_s6 + $0xa8] sm:$0xff] }
 0x328   :  { %5701 = vmatprep.subr.bf16.mxu0 %v5682_v32  ;;  %v5774_v30 = vpack.c.bf16 %v4353_v27, %v4352_v26  ;;  %v4389_v42 = vld [vmem:[%s6960_s6 + $0x128] sm:$0xff]  ;;  %v4364_v27 = vld [vmem:[%s6961_s7 + $0x30] sm:$0xff] }
 0x32b   :  { %5703 = vmatpush3.bf16.msra.mxu0 %v5682_v32  ;;  %v4355_v32 = vld [vmem:[%s6960_s6 + $0xb8] sm:$0xf] }
 0x32c   :  { %5706 = vmatprep.subr.msk.bf16.mxu0 %vm6451_vm6, %v5686_v38  ;;  %v5778_v33 = vpack.c.bf16 %v4355_v32, %v4354_v31 }
 0x32f   :  { %5709 = vmatpush3.bf16.msk.msra.mxu0 %vm6451_vm6, %v5686_v38  ;;  %v4386_v38 = vld [vmem:[%s6960_s6 + $0x110] sm:$0xff] }
 0x330   :  { %5729 = vmatprep.subr.bf16.mxu0 %v5728_v49  ;;  %v5826_v40 = vpack.c.bf16 %v4387_v39, %v4386_v38  ;;  %v4365_v39 = vld [vmem:[%s6961_s7 + $0x38] sm:$0x3] }
 0x332   :  { %5204 = vmatmul.mubr.msk.f32.vlgmr.msra.gmra.mrb[22].mxu0 %vm1685_vm3, %v4312_v43  ;;  %v5830_v43 = vpack.c.bf16 %v4389_v42, %v4388_v41  ;;  %v4383_v41 = vld [vmem:[%s6961_s7 + $0x48] sm:$0x3]  ;;  %v2848_v42 = vld [vmem:[%s6963_s9 + $0x20] sm:$0xff] }
 0x333   :  { %5206 = vmatprep.mubr.msk.f32.mxu0 %vm1685_vm3, %v4313_v44  ;;  %5731 = vmatpush3.bf16.msra.mxu0 %v5728_v49  ;;  %v4390_v44 = vld [vmem:[%s6960_s6 + $0x130] sm:$0xff] }
 0x334   :  { %5733 = vmatprep.subr.bf16.mxu0 %v5732_v54 }
 0x336   :  { %5207 = vmatmul.mubr.msk.f32.gmra.mrb[24].mxu0 %vm1685_vm3, %v4314_v45  ;;  %v4391_v45 = vld [vmem:[%s6960_s6 + $0x138] sm:$0xf] }
 0x337   :  { %5735 = vmatpush3.bf16.msra.mxu0 %v5732_v54  ;;  %v5834_v46 = vpack.c.bf16 %v4391_v45, %v4390_v44  ;;  %v4404_v44 = vld [vmem:[%s6963_s9 + $0x30] sm:$0xff] }
 0x338   :  { %5737 = vmatprep.subr.bf16.mxu0 %v5736_v61 }
 0x33b   :  { %5739 = vmatpush3.bf16.msra.mxu0 %v5736_v61  ;;  %v4326_v61 = vld [vmem:[%s6961_s7 + $0x18] sm:$0x3] }
 0x33c   :  { %5742 = vmatprep.subr.msk.bf16.mxu0 %vm6451_vm6, %v5740_v2 }
 0x33f   :  { %5745 = vmatpush3.bf16.msk.msra.mxu0 %vm6451_vm6, %v5740_v2 }
 0x340   :  { %5767 = vmatprep.subr.bf16.mxu0 %v5766_v8 }
 0x3f5   :  { %v5183_v9 = vpop.f32.mrb[18].mxu0 }
 0x3f6   :  { %v1768_v10 = vpop.f32.mrb[19].mxu0 }
 0x3f9   :  { %v5186_v11 = vpop.f32.mrb[20].mxu0 }
 0x3fa   :  { %v1778_v12 = vpop.f32.mrb[21].mxu0 }
 0x405   :  { %v5205_v13 = vpop.f32.mrb[22].mxu0 }
 0x406   :  { %v1890_v14 = vmax.f32 %v5183_v9, %v5205_v13  ;;  %v1870_v15 = vpop.f32.mrb[23].mxu0  ;;  %v5794_v9 = vpack.c.bf16 %v4367_v5, %v4366_v4  ;;  %v4420_v5 = vld [vmem:[%s6966_s12 + $0x18] sm:$0xff] }
 0x407   :  { %v1889_v16 = vmax.f32 %v1768_v10, %v1870_v15  ;;  %v4368_v10 = vld [vmem:[%s6960_s6 + $0xd0] sm:$0xff]  ;;  %v4371_v15 = vld [vmem:[%s6960_s6 + $0xe8] sm:$0xff] }
 0x408   :  { %v6561_v21 = vmax.f32 %v1890_v14, 0.0  ;;  %v4370_v14 = vld [vmem:[%s6960_s6 + $0xe0] sm:$0xff] }
 0x409   :  { %v6559_v19 = vmax.f32 %v1889_v16, 0.0  ;;  %v5208_v20 = vpop.f32.mrb[24].mxu0  ;;  %v5802_v16 = vpack.c.bf16 %v4371_v15, %v4370_v14 }
 0x40a   :  { %v1892_v22 = vmax.f32 %v5186_v11, %v5208_v20  ;;  %v1880_v23 = vpop.f32.mrb[25].mxu0  ;;  %v4369_v11 = vld [vmem:[%s6960_s6 + $0xd8] sm:$0xff] }
 0x40b   :  { %v1891_v25 = vmax.f32 %v1778_v12, %v1880_v23  ;;  %5225 = vmatprep.mubr.msk.f32.mxu1 %vm1685_vm3, %v6559_v19  ;;  %5247 = vmatprep.mubr.msk.f32.mxu0 %vm1685_vm3, %v6559_v19  ;;  %v4347_v12 = vld [vmem:[%s6961_s7 + $0x28] sm:$0x3]  ;;  %v5798_v13 = vpack.c.bf16 %v4369_v11, %v4368_v10 }
 0x40c   :  { %5226 = vmatmul.mubr.msk.f32.vlgmr.msra.gmra.mrb[56].mxu1 %vm1685_vm3, %v6561_v21  ;;  %5248 = vmatmul.mubr.msk.f32.vlgmr.msra.gmra.mrb[26].mxu0 %vm1685_vm3, %v6561_v21  ;;  %v6579_v29 = vmax.f32 %v1892_v22, 0.0  ;;  %v3250_v10 = vld [vmem:[%s6966_s12 + $0x8] sm:$0xff] }
 0x40d   :  { %v6577_v28 = vmax.f32 %v1891_v25, 0.0  ;;  %5769 = vmatpush3.bf16.msra.mxu0 %v5766_v8 }
 0x40e   :  { %5771 = vmatprep.subr.bf16.mxu0 %v5770_v24 }
 0x40f   :  { %5228 = vmatprep.mubr.msk.f32.mxu1 %vm1685_vm3, %v6577_v28  ;;  %5250 = vmatprep.mubr.msk.f32.mxu0 %vm1685_vm3, %v6577_v28 }
 0x410   :  { %5229 = vmatmul.mubr.msk.f32.gmra.mrb[58].mxu1 %vm1685_vm3, %v6579_v29  ;;  %5251 = vmatmul.mubr.msk.f32.gmra.mrb[28].mxu0 %vm1685_vm3, %v6579_v29 }
 0x411   :  { %5773 = vmatpush3.bf16.msra.mxu0 %v5770_v24  ;;  %5291 = vmatprep.mubr.msk.f32.mxu0 %vm1685_vm3, %v6559_v19  ;;  %v5806_v24 = vpack.c.bf16 %v4373_v18, %v4372_v17  ;;  %v3251_v17 = vld [vmem:[%s6966_s12 + $0x10] sm:$0xf] }
 0x412   :  { %5775 = vmatprep.subr.bf16.mxu0 %v5774_v30  ;;  %5261 = vmatprep.mubr.msk.f32.mxu1 %vm2107_vm7, %v4325_v47  ;;  %v4430_v18 = vld [vmem:[%s6966_s12 + $0x30] sm:$0xff] }
 0x415   :  { %5777 = vmatpush3.bf16.msra.mxu0 %v5774_v30 }
 0x416   :  { %5780 = vmatprep.subr.msk.bf16.mxu0 %vm6451_vm6, %v5778_v33 }
 0x419   :  { %5783 = vmatpush3.bf16.msk.msra.mxu0 %vm6451_vm6, %v5778_v33 }
 0x41a   :  { %5823 = vmatprep.subr.bf16.mxu0 %v5822_v36 }
 0x41c   :  { %5292 = vmatmul.mubr.msk.f32.vlgmr.msra.gmra.mrb[30].mxu0 %vm1685_vm3, %v6561_v21 }
 0x41d   :  { %5294 = vmatprep.mubr.msk.f32.mxu0 %vm1685_vm3, %v6577_v28  ;;  %5825 = vmatpush3.bf16.msra.mxu0 %v5822_v36 }
 0x41e   :  { %5827 = vmatprep.subr.bf16.mxu0 %v5826_v40 }
 0x420   :  { %5295 = vmatmul.mubr.msk.f32.gmra.mrb[32].mxu0 %vm1685_vm3, %v6579_v29 }
 0x421   :  { %5829 = vmatpush3.bf16.msra.mxu0 %v5826_v40  ;;  %5357 = vmatprep.mubr.msk.f32.mxu0 %vm1685_vm3, %v6559_v19  ;;  %v4382_v40 = vld [vmem:[%s6961_s7 + $0x40] sm:$0xff] }
 0x422   :  { %5831 = vmatprep.subr.bf16.mxu0 %v5830_v43 }
 0x425   :  { %5833 = vmatpush3.bf16.msra.mxu0 %v5830_v43  ;;  %v4403_v43 = vld [vmem:[%s6963_s9 + $0x28] sm:$0xff] }
 0x426   :  { %5836 = vmatprep.subr.msk.bf16.mxu0 %vm6451_vm6, %v5834_v46  ;;  %v5858_v45 = vpack.c.bf16 %v4404_v44, %v4403_v43  ;;  %v4440_v43 = vld [vmem:[%s6966_s12 + $0x58] sm:$0xf] }
 0x429   :  { %5839 = vmatpush3.bf16.msk.msra.mxu0 %vm6451_vm6, %v5834_v46  ;;  %v4400_v46 = vld [vmem:[%s6962_s8] ss:$0 sm:$0xff] }
 0x42c   :  { %5358 = vmatmul.mubr.msk.f32.vlgmr.msra.gmra.mrb[34].mxu0 %vm1685_vm3, %v6561_v21 }
 0x42d   :  { %5360 = vmatprep.mubr.msk.f32.mxu0 %vm1685_vm3, %v6577_v28 }
 0x430   :  { %5361 = vmatmul.mubr.msk.f32.gmra.mrb[36].mxu0 %vm1685_vm3, %v6579_v29 }
 0x4df   :  { %v5227_v48 = vpop.f32.mrb[56].mxu1  ;;  %v5249_v49 = vpop.f32.mrb[26].mxu0 }
 0x4e0   :  { %v1988_v50 = vpop.f32.mrb[57].mxu1  ;;  %v2088_v51 = vpop.f32.mrb[27].mxu0 }
 0x4e1   :  { %v5756_v52 = vpack.c.bf16 %v5227_v48, %v1988_v50  ;;  %v5746_v53 = vpack.c.bf16 %v5249_v49, %v2088_v51  ;;  %v4405_v48 = vld [vmem:[%s6963_s9 + $0x38] sm:$0xff]  ;;  %v4406_v49 = vld [vmem:[%s6963_s9 + $0x40] sm:$0xff] }
 0x4e3   :  { %v5230_v54 = vpop.f32.mrb[58].mxu1  ;;  %v5252_v55 = vpop.f32.mrb[28].mxu0  ;;  %5747 = vmatprep.subr.bf16.mxu1 %v5746_v53 }
 0x4e4   :  { %v1998_v56 = vpop.f32.mrb[59].mxu1  ;;  %v2098_v57 = vpop.f32.mrb[29].mxu0  ;;  %5749 = vmatpush3.bf16.msra.mxu1 %v5746_v53  ;;  %v5862_v53 = vpack.c.bf16 %v4406_v49, %v4405_v48  ;;  %v4454_v49 = vld [vmem:[%s6966_s12 + $0x78] sm:$0xff] }
 0x4e5   :  { %v5760_v59 = vpack.c.bf16 %v5230_v54, %v1998_v56  ;;  %v5750_v60 = vpack.c.bf16 %v5252_v55, %v2098_v57  ;;  %v4407_v54 = vld [vmem:[%s6963_s9 + $0x48] sm:$0xff]  ;;  %v5966_v55 = vmov 0.0|0.0   ;;  %v5968_v56 = vmov 0.0  }
 0x4e7   :  { %5752 = vmatprep.subr.msk.bf16.mxu1 %vm6648_vm9, %v5750_v60 }
 0x4e8   :  { %5755 = vmatpush3.bf16.msk.msra.mxu1 %vm6648_vm9, %v5750_v60 }
 0x4e9   :  { %5757 = vmatprep.subr.bf16.mxu1 %v5756_v52 }
 0x4eb   :  { %5262 = vmatmul.mubr.msk.f32.vlgmr.msra.gmra.mrb[60].mxu1 %vm2107_vm7, %v4326_v61 }
 0x4ec   :  { %5759 = vmatpush3.bf16.msra.mxu1 %v5756_v52  ;;  %5272 = vmatprep.mubr.msk.f32.mxu1 %vm2107_vm7, %v1897_v62 }
 0x4ed   :  { %5762 = vmatprep.subr.msk.bf16.mxu1 %vm6648_vm9, %v5760_v59 }
 0x4ef   :  { %v5293_v63 = vpop.f32.mrb[30].mxu0 }
 0x4f0   :  { %v2358_v0 = vpop.f32.mrb[31].mxu0  ;;  %5765 = vmatpush3.bf16.msk.msra.mxu1 %vm6648_vm9, %v5760_v59 }
 0x4f1   :  { %v5784_v2 = vpack.c.bf16 %v5293_v63, %v2358_v0  ;;  %v3014_v0 = vld [vmem:[%s6964_s10] sm:$0x1f] }
 0x4f3   :  { %v5296_v6 = vpop.f32.mrb[32].mxu0  ;;  %5785 = vmatprep.subr.bf16.mxu1 %v5784_v2  ;;  %5273 = vmatmul.mubr.msk.f32.vlgmr.msra.gmra.mrb[60].mxu1 %vm2107_vm7, %v1898_v1  ;;  %v4412_v1 = vld [vmem:[%s6964_s10 + $0x8] sm:$0x1f] }
 0x4f4   :  { %v2368_v7 = vpop.f32.mrb[33].mxu0  ;;  %5787 = vmatpush3.bf16.msra.mxu1 %v5784_v2  ;;  %5305 = vmatprep.mubr.msk.f32.mxu1 %vm2107_vm7, %v4346_v3 }
 0x4f5   :  { %v5788_v8 = vpack.c.bf16 %v5296_v6, %v2368_v7 }
 0x4f7   :  { %5790 = vmatprep.subr.msk.bf16.mxu1 %vm6648_vm9, %v5788_v8 }
 0x4f8   :  { %5793 = vmatpush3.bf16.msk.msra.mxu1 %vm6648_vm9, %v5788_v8  ;;  %v4421_v8 = vld [vmem:[%s6966_s12 + $0x20] sm:$0xff] }
 0x4f9   :  { %5795 = vmatprep.subr.bf16.mxu1 %v5794_v9  ;;  %v5875_v14 = vpack.c.bf16 %v4421_v8, %v4420_v5 }
 0x4fb   :  { %5306 = vmatmul.mubr.msk.f32.vlgmr.msra.gmra.mrb[60].mxu1 %vm2107_vm7, %v4347_v12  ;;  %v4417_v12 = vld [vmem:[%s6965_s11 + $0x2] sm:$0x3] }
 0x4fc   :  { %5797 = vmatpush3.bf16.msra.mxu1 %v5794_v9  ;;  %5324 = vmatprep.mubr.msk.f32.mxu1 %vm1685_vm3, %v6559_v19  ;;  %v3249_v9 = vld [vmem:[%s6966_s12] sm:$0xff] }
 0x4fd   :  { %5799 = vmatprep.subr.bf16.mxu1 %v5798_v13  ;;  %v5878_v15 = vpack.c.bf16 %v3250_v10, %v3249_v9 }
 0x4ff   :  { %v5359_v20 = vpop.f32.mrb[34].mxu0 }
 0x500   :  { %v2730_v22 = vpop.f32.mrb[35].mxu0  ;;  %5801 = vmatpush3.bf16.msra.mxu1 %v5798_v13  ;;  %v3170_v13 = vld [vmem:[%s6965_s11] sm:$0x3] }
 0x501   :  { %v5840_v23 = vpack.c.bf16 %v5359_v20, %v2730_v22  ;;  %5803 = vmatprep.subr.bf16.mxu1 %v5802_v16  ;;  %v4431_v20 = vld [vmem:[%s6966_s12 + $0x38] sm:$0xff] }
 0x502   :  { %v5881_v22 = vpack.c.bf16 %v4431_v20, %v4430_v18 }
 0x503   :  { %v5362_v25 = vpop.f32.mrb[36].mxu0 }
 0x504   :  { %v2740_v26 = vpop.f32.mrb[37].mxu0  ;;  %5805 = vmatpush3.bf16.msra.mxu1 %v5802_v16  ;;  %v4422_v16 = vld [vmem:[%s6966_s12 + $0x28] sm:$0xf] }
 0x505   :  { %v5844_v19 = vpack.c.bf16 %v5362_v25, %v2740_v26  ;;  %5808 = vmatprep.subr.msk.bf16.mxu1 %vm6451_vm6, %v5806_v24 }
 0x508   :  { %5811 = vmatpush3.bf16.msk.msra.mxu1 %vm6451_vm6, %v5806_v24 }
 0x50b   :  { %5325 = vmatmul.mubr.msk.f32.vlgmr.msra.gmra.mrb[62].mxu1 %vm1685_vm3, %v6561_v21  ;;  %v2845_v21 = vld [vmem:[%s6963_s9 + $0x8] sm:$0xff] }
 0x50c   :  { %5327 = vmatprep.mubr.msk.f32.mxu1 %vm1685_vm3, %v6577_v28  ;;  %v2846_v28 = vld [vmem:[%s6963_s9 + $0x10] sm:$0xff]  ;;  %v5850_v30 = vpack.c.bf16 %v2845_v21, %v2844_v37  ;;  %v4443_v37 = vld [vmem:[%s6965_s11 + $0x8] sm:$0x3]  ;;  %v4432_v21 = vld [vmem:[%s6966_s12 + $0x40] sm:$0xf] }
 0x50e   :  { %5851 = vmatprep.subr.bf16.mxu0 %v5850_v30 }
 0x50f   :  { %5328 = vmatmul.mubr.msk.f32.gmra.mrb[64].mxu1 %vm1685_vm3, %v6579_v29  ;;  %v2847_v29 = vld [vmem:[%s6963_s9 + $0x18] sm:$0xff]  ;;  %5853 = vmatpush3.bf16.msra.mxu0 %v5850_v30  ;;  %v4447_v30 = vld [vmem:[%s6966_s12 + $0x68] sm:$0xff] }
 0x510   :  { %5338 = vmatprep.mubr.msk.f32.mxu1 %vm2107_vm7, %v4364_v27  ;;  %v5854_v31 = vpack.c.bf16 %v2847_v29, %v2846_v28  ;;  %v4435_v27 = vld [vmem:[%s6965_s11 + $0x6] sm:$0x3] }
 0x511   :  { %v4446_v28 = vld [vmem:[%s6966_s12 + $0x60] sm:$0xff] }
 0x512   :  { %5855 = vmatprep.subr.bf16.mxu0 %v5854_v31  ;;  %v5887_v29 = vpack.c.bf16 %v4447_v30, %v4446_v28 }
 0x513   :  { %5857 = vmatpush3.bf16.msra.mxu0 %v5854_v31  ;;  %v4448_v31 = vld [vmem:[%s6966_s12 + $0x70] sm:$0xf] }
 0x514   :  { %5382 = vmatprep.subr.mxu0 %v2848_v42 }
 0x517   :  { %5383 = vmatpush3.msra.mxu0 %v2848_v42 }
 0x518   :  { %5859 = vmatprep.subr.bf16.mxu0 %v5858_v45 }
 0x5de   :  { %v5326_v32 = vpop.f32.mrb[62].mxu1 }
 0x5df   :  { %v2544_v33 = vpop.f32.mrb[63].mxu1 }
 0x5e0   :  { %v5812_v34 = vpack.c.bf16 %v5326_v32, %v2544_v33  ;;  %v4438_v32 = vld [vmem:[%s6966_s12 + $0x48] sm:$0xff]  ;;  %v4439_v33 = vld [vmem:[%s6966_s12 + $0x50] sm:$0xff] }
 0x5e2   :  { %v5329_v35 = vpop.f32.mrb[64].mxu1  ;;  %5813 = vmatprep.subr.bf16.mxu1 %v5812_v34 }
 0x5e3   :  { %v2554_v36 = vpop.f32.mrb[65].mxu1  ;;  %5815 = vmatpush3.bf16.msra.mxu1 %v5812_v34 }
 0x5e4   :  { %v5816_v38 = vpack.c.bf16 %v5329_v35, %v2554_v36 }
 0x5e6   :  { %5818 = vmatprep.subr.msk.bf16.mxu1 %vm6648_vm9, %v5816_v38 }
 0x5e7   :  { %5821 = vmatpush3.bf16.msk.msra.mxu1 %vm6648_vm9, %v5816_v38 }
 0x5e8   :  { %5841 = vmatprep.subr.bf16.mxu1 %v5840_v23 }
 0x5ea   :  { %5339 = vmatmul.mubr.msk.f32.vlgmr.msra.gmra.mrb[60].mxu1 %vm2107_vm7, %v4365_v39 }
 0x5eb   :  { %5843 = vmatpush3.bf16.msra.mxu1 %v5840_v23  ;;  %5371 = vmatprep.mubr.msk.f32.mxu1 %vm2107_vm7, %v4382_v40  ;;  %v5884_v40 = vpack.c.bf16 %v4439_v33, %v4438_v32 }
 0x5ec   :  { %5846 = vmatprep.subr.msk.bf16.mxu1 %vm6648_vm9, %v5844_v19 }
 0x5ef   :  { %5849 = vmatpush3.bf16.msk.msra.mxu1 %vm6648_vm9, %v5844_v19  ;;  %v4427_v19 = vld [vmem:[%s6965_s11 + $0x4] sm:$0x3] }
 0x5f0   :  { %5866 = vmatprep.subr.bf16.mxu1 %v5966_v55 }
 0x5f2   :  { %5372 = vmatmul.mubr.msk.f32.vlgmr.msra.gmra.mrb[60].mxu1 %vm2107_vm7, %v4383_v41 }
 0x5f3   :  { %5404 = vmatprep.mubr.msk.f32.mxu1 %vm5967_vm11, %v5968_v56 }
 0x6c5   :  { %v5373_v47 = vpop.f32.mrb[60].mxu1 }
 0x6c6   :  { %v2824_v50 = vpop.f32.mrb[61].mxu1  ;;  %v2843_v52 = vadd.f32 %v5373_v47, %v4400_v46  ;;  %v4451_v47 = vld [vmem:[%s6965_s11 + $0xa] sm:$0x3] }
 0x6c7   :  { %v2842_v51 = vadd.f32 %v4400_v46, %v2824_v50  ;;  %v4455_v50 = vld [vmem:[%s6966_s12 + $0x80] sm:$0xff] }
 0x6c9   :  { %5384 = vmatprep.mubr.msk.f32.mxu0 %vm2849_vm10, %v2842_v51 }
 0x6ca   :  { %5385 = vmatmul.mubr.msk.f32.vlgmr.msra.gmra.mrb[38].mxu0 %vm2849_vm10, %v2843_v52 }
 0x6cb   :  { %5861 = vmatpush3.bf16.msra.mxu0 %v5858_v45  ;;  %5397 = vmatprep.mubr.msk.f32.mxu0 %vm2849_vm10, %v2842_v51  ;;  %v5890_v51 = vpack.c.bf16 %v4455_v50, %v4454_v49 }
 0x6cc   :  { %5863 = vmatprep.subr.bf16.mxu0 %v5862_v53 }
 0x6cf   :  { %5865 = vmatpush3.bf16.msra.mxu0 %v5862_v53 }
 0x6d0   :  { %5395 = vmatprep.subr.mxu0 %v4407_v54 }
 0x6d3   :  { %5396 = vmatpush3.msra.mxu0 %v4407_v54 }
 0x6d4   :  { %5398 = vmatmul.mubr.msk.f32.vlgmr.msra.gmra.mrb[40].mxu0 %vm2849_vm10, %v2843_v52  ;;  %5414 = vmatprep.subr.mxu0 %v5968_v56  ;;  %v4456_v52 = vld [vmem:[%s6966_s12 + $0x88] sm:$0xf]  ;;  %s5969_s12 = smov [#allocation2]  }
 0x6d5   :  { %5416 = vmatprep.mubr.msk.f32.mxu0 %vm5967_vm11, %v5968_v56 }
 0x79d   :  { %v5386_v57 = vpop.f32.mrb[38].mxu0 }
 0x79e   :  { %v2922_v58 = vpop.f32.mrb[39].mxu0 }
 0x7a7   :  { %v5399_v59 = vpop.f32.mrb[40].mxu0 }
 0x7a8   :  { %v3013_v60 = vmax.f32 %v5386_v57, %v5399_v59  ;;  %v3003_v61 = vpop.f32.mrb[41].mxu0 }
 0x7a9   :  { %v3012_v62 = vmax.f32 %v2922_v58, %v3003_v61 }
 0x7ab   :  { %v5867_v63 = vpack.c.bf16 %v3013_v60, %v3012_v62 }
 0x7ad   :  { %5869 = vmatpush3.bf16.msk.msra.mxu1 %vm5868_vm13, %v5867_v63 }
 0x7ae   :  { %5870 = vmatprep.subr.bf16.mxu1 %v5966_v55 }
 0x7b0   :  { %5405 = vmatmul.mubr.msk.f32.vlgmr.msra.gmra.mrb[66].mxu1 %vm3015_vm14, %v3014_v0 }
 0x7b1   :  { %5873 = vmatpush3.bf16.msk.msra.mxu1 %vm5868_vm13, %v5867_v63  ;;  %5411 = vmatprep.mubr.msk.f32.mxu1 %vm5967_vm11, %v5968_v56 }
 0x7b2   :  { %5419 = vmatprep.subr.mxu1 %v5968_v56 }
 0x7b4   :  { %5412 = vmatmul.mubr.msk.f32.vlgmr.msra.gmra.mrb[68].mxu1 %vm3015_vm14, %v4412_v1  ;;  %v4459_v1 = vld [vmem:[%s6967_s13] ss:$0 sm:$0xff]  ;;  %s4136_s13 = sshll.u32 %s5969_s12, 4  ;;  %s4137_s13 = int_to_ptr.vmem [resolvable:$true] %s4136_s13 }
 0x7b5   :  { %5421 = vmatprep.mubr.msk.f32.mxu1 %vm5967_vm11, %v5968_v56  ;;  %s5941_s4 = scalar_lea.vmem %s4137_s13, 32  ;;  %p5946_p1 = scmp.lt.s32.totalorder %s4137_s13, %s4137_s13 }
 0x7b6   :  { %p5942_p0 = scmp.ne.s32.totalorder %s4137_s13, %s5941_s4  ;;  %p5947_p2 = scmp.lt.s32.totalorder %s5941_s4, %s5941_s4 }
 0x7b8   :  { %p5948_p3 = por %p5947_p2, %p5946_p1 }
 0x7ba   :  { %p5949_p4 = pnand %p5948_p3, %p5942_p0 }
 0x883   :  { %v3089_v2 = vpop.f32.mrb[66].mxu1 }
 0x884   :  { %v5406_v3 = vpop.f32.mrb[67].mxu1 }
 0x887   :  { %v3164_v4 = vpop.f32.mrb[68].mxu1 }
 0x888   :  { %v3168_v6 = vmax.f32 %v3089_v2, %v3164_v4  ;;  %v5413_v7 = vpop.f32.mrb[69].mxu1 }
 0x88a   :  { %v6808_v11 = vmax.f32 %v3168_v6, 0.0 }
 0x88c   :  { %5415 = vmatpush3.msk.msra.mxu0 %vm3175_vm15, %v6808_v11  ;;  %5420 = vmatpush3.msk.msra.mxu1 %vm3175_vm15, %v6808_v11 }
 0x88d   :  { %5422 = vmatmul.mubr.msk.f32.vlgmr.msra.gmra.mrb[70].mxu1 %vm3171_vm0, %v4417_v12  ;;  %5417 = vmatmul.mubr.msk.f32.vlgmr.msra.gmra.mrb[42].mxu0 %vm3171_vm0, %v3170_v13 }
 0x88e   :  { %5874 = vmatprep.subr.bf16.mxu0 %v5966_v55  ;;  %5877 = vmatprep.subr.bf16.mxu1 %v5966_v55 }
 0x88f   :  { %5876 = vmatpush3.bf16.msra.mxu0 %v5875_v14  ;;  %5879 = vmatpush3.bf16.msra.mxu1 %v5878_v15 }
 0x890   :  { %5428 = vmatprep.subr.mxu0 %v5968_v56  ;;  %5430 = vmatprep.mubr.msk.f32.mxu0 %vm5967_vm11, %v5968_v56 }
 0x891   :  { %5437 = vmatprep.subr.mxu1 %v5968_v56  ;;  %5439 = vmatprep.mubr.msk.f32.mxu1 %vm5967_vm11, %v5968_v56 }
 0x893   :  { %5429 = vmatpush3.msk.msra.mxu0 %vm1698_vm4, %v4422_v16  ;;  %5438 = vmatpush3.msk.msra.mxu1 %vm1698_vm4, %v3251_v17 }
 0x894   :  { %5442 = vmatprep.subr.mxu0 %v5968_v56  ;;  %5880 = vmatprep.subr.bf16.mxu1 %v5966_v55 }
 0x960   :  { %v3323_v23 = vpop.f32.mrb[70].mxu1  ;;  %v3245_v24 = vpop.f32.mrb[42].mxu0 }
 0x961   :  { %5431 = vmatmul.mubr.msk.f32.vlgmr.msra.gmra.mrb[44].mxu0 %vm3331_vm1, %v3323_v23  ;;  %v5423_v25 = vpop.f32.mrb[71].mxu1  ;;  %5440 = vmatmul.mubr.msk.f32.vlgmr.msra.gmra.mrb[72].mxu1 %vm3331_vm1, %v3245_v24  ;;  %v5418_v26 = vpop.f32.mrb[43].mxu0 }
 0x962   :  { %5443 = vmatpush3.msk.msra.mxu0 %vm3175_vm15, %v6808_v11  ;;  %5444 = vmatprep.mubr.msk.f32.mxu0 %vm5967_vm11, %v5968_v56 }
 0x963   :  { %5456 = vmatprep.subr.mxu0 %v5968_v56  ;;  %5882 = vmatpush3.bf16.msra.mxu1 %v5881_v22 }
 0x964   :  { %5451 = vmatprep.subr.mxu1 %v5968_v56  ;;  %5453 = vmatprep.mubr.msk.f32.mxu1 %vm5967_vm11, %v5968_v56 }
 0x965   :  { %5445 = vmatmul.mubr.msk.f32.vlgmr.msra.gmra.mrb[46].mxu0 %vm3171_vm0, %v4427_v19 }
 0x966   :  { %5457 = vmatpush3.msk.msra.mxu0 %vm3175_vm15, %v6808_v11  ;;  %5458 = vmatprep.mubr.msk.f32.mxu0 %vm5967_vm11, %v5968_v56 }
 0x967   :  { %5470 = vmatprep.subr.mxu0 %v5968_v56  ;;  %5452 = vmatpush3.msk.msra.mxu1 %vm1698_vm4, %v4432_v21 }
 0x968   :  { %5883 = vmatprep.subr.bf16.mxu1 %v5966_v55 }
 0x969   :  { %5459 = vmatmul.mubr.msk.f32.vlgmr.msra.gmra.mrb[48].mxu0 %vm3171_vm0, %v4435_v27 }
 0x96a   :  { %5471 = vmatpush3.msk.msra.mxu0 %vm3175_vm15, %v6808_v11  ;;  %5472 = vmatprep.mubr.msk.f32.mxu0 %vm5967_vm11, %v5968_v56 }
 0x96b   :  { %5886 = vmatprep.subr.bf16.mxu0 %v5966_v55 }
 0x96d   :  { %5473 = vmatmul.mubr.msk.f32.vlgmr.msra.gmra.mrb[50].mxu0 %vm3171_vm0, %v4443_v37 }
 0x96e   :  { %5481 = vmatprep.mubr.msk.f32.mxu0 %vm5967_vm11, %v5968_v56  ;;  %5888 = vmatpush3.bf16.msra.mxu0 %v5887_v29 }
 0x96f   :  { %5479 = vmatprep.subr.mxu0 %v5968_v56 }
 0x972   :  { %5480 = vmatpush3.msk.msra.mxu0 %vm1698_vm4, %v4448_v31 }
 0xa34   :  { %v3404_v34 = vpop.f32.mrb[44].mxu0  ;;  %v3480_v35 = vpop.f32.mrb[72].mxu1 }
 0xa35   :  { %v5432_v36 = vpop.f32.mrb[45].mxu0  ;;  %v3481_v38 = vadd.f32 %v3480_v35, %v3404_v34  ;;  %v5441_v39 = vpop.f32.mrb[73].mxu1 }
 0xa38   :  { %v3555_v41 = vpop.f32.mrb[46].mxu0 }
 0xa39   :  { %5454 = vmatmul.mubr.msk.f32.vlgmr.msra.gmra.mrb[74].mxu1 %vm3331_vm1, %v3555_v41  ;;  %v5446_v42 = vpop.f32.mrb[47].mxu0 }
 0xa3a   :  { %5885 = vmatpush3.bf16.msra.mxu1 %v5884_v40  ;;  %5467 = vmatprep.mubr.msk.f32.mxu1 %vm5967_vm11, %v5968_v56 }
 0xa3b   :  { %5465 = vmatprep.subr.mxu1 %v5968_v56 }
 0xa3c   :  { %v3711_v44 = vpop.f32.mrb[48].mxu0 }
 0xa3d   :  { %v5460_v45 = vpop.f32.mrb[49].mxu0 }
 0xa3e   :  { %5466 = vmatpush3.msk.msra.mxu1 %vm1698_vm4, %v4440_v43 }
 0xa3f   :  { %5468 = vmatmul.mubr.msk.f32.vlgmr.msra.gmra.mrb[76].mxu1 %vm3331_vm1, %v3711_v44  ;;  %5484 = vmatprep.subr.mxu1 %v5968_v56 }
 0xa40   :  { %5485 = vmatpush3.msk.msra.mxu1 %vm3175_vm15, %v6808_v11  ;;  %v3867_v46 = vpop.f32.mrb[50].mxu0  ;;  %5486 = vmatprep.mubr.msk.f32.mxu1 %vm5967_vm11, %v5968_v56 }
 0xa41   :  { %5482 = vmatmul.mubr.msk.f32.vlgmr.msra.gmra.mrb[52].mxu0 %vm3331_vm1, %v3867_v46  ;;  %5889 = vmatprep.subr.bf16.mxu1 %v5966_v55  ;;  %v5474_v48 = vpop.f32.mrb[51].mxu0 }
 0xa43   :  { %5487 = vmatmul.mubr.msk.f32.vlgmr.msra.gmra.mrb[78].mxu1 %vm3171_vm0, %v4451_v47 }
 0xa44   :  { %5495 = vmatprep.mubr.msk.f32.mxu1 %vm5967_vm11, %v5968_v56  ;;  %5891 = vmatpush3.bf16.msra.mxu1 %v5890_v51 }
 0xa45   :  { %5493 = vmatprep.subr.mxu1 %v5968_v56 }
 0xa48   :  { %5494 = vmatpush3.msk.msra.mxu1 %vm1698_vm4, %v4456_v52 }
 0xb0c   :  { %v3635_v53 = vpop.f32.mrb[74].mxu1 }
 0xb0d   :  { %v3639_v54 = vadd.f32 %v3635_v53, %v3481_v38  ;;  %v5455_v55 = vpop.f32.mrb[75].mxu1 }
 0xb12   :  { %v3791_v57 = vpop.f32.mrb[76].mxu1 }
 0xb13   :  { %v3795_v58 = vadd.f32 %v3791_v57, %v3639_v54  ;;  %v5469_v59 = vpop.f32.mrb[77].mxu1 }
 0xb14   :  { %v3947_v60 = vpop.f32.mrb[52].mxu0 }
 0xb15   :  { %v3951_v61 = vadd.f32 %v3947_v60, %v3795_v58  ;;  %v5483_v62 = vpop.f32.mrb[53].mxu0 }
 0xb16   :  { %v4023_v63 = vpop.f32.mrb[78].mxu1 }
 0xb17   :  { %5496 = vmatmul.mubr.msk.f32.vlgmr.msra.gmra.mrb[80].mxu1 %vm3331_vm1, %v4023_v63  ;;  %v5488_v0 = vpop.f32.mrb[79].mxu1 }
 0xbea   :  { %v4103_v56 = vpop.f32.mrb[80].mxu1 }
 0xbeb   :  { %v4107_v2 = vadd.f32 %v4103_v56, %v3951_v61  ;;  %v5497_v3 = vpop.f32.mrb[81].mxu1 }
 0xbed   :  { %v4115_v4 = vadd.f32 %v4459_v1, %v4107_v2 }
 0xbef   :  { %v4117_v5 = vsel %vm4116_vm2, %v4115_v4, -inf }
 0xbf0   :  { %4118 = vmax.xlane.f32.xlu0 %v4117_v5 }
 0xc7d   :  { %v4119_v6 = vpop.xlane.xlu0 %4118 }
 0xc7e   :  { %v4120_v7 = vsub.f32 %v4115_v4, %v4119_v6 }
 0xc80   :  { %v4121_v8 = vmul.f32 1.442695, %v4120_v7 }
 0xc82   :  { %5937 = vpow2.f32 %v4121_v8 }
 0xc8c   :  { %v5938_v9 = vpop.eup %5937 }
 0xc8d   :  { %v4123_v10 = vsel %vm4116_vm2, %v5938_v9, 0.0 }
 0xc8e   :  { %4124 = vadd.xlane.f32.xlu0 %v4123_v10 }
 0xd1b   :  { %v4125_v11 = vpop.xlane.xlu0 %4124 }
 0xd1c   :  { %5939 = vlog2.f32 %v4125_v11 }
 0xd26   :  { %v5940_v12 = vpop.eup %5939 }
 0xd27   :  { %v4127_v13 = vmul.f32 0.6931472, %v5940_v12 }
 0xd29   :  { %v4128_v14 = vsub.f32 %v4120_v7, %v4127_v13 }
 0xd2b   :  { %4129 = vst.msk [vmem:[#allocation2] sm:$0x3] %vm4116_vm2, %v4128_v14 }
 0xd2c   :  { %5952 = shalt.err (!%p5949_p4)
}
 0xd2d   :  { %s5953_s17 = scalar_lea.hbm %s6968_s14, 32 }
 0xd2e   :  { %p5954_p5 = scmp.ne.s32.totalorder %s6968_s14, %s5953_s17  ;;  %p5957_p6 = scmp.lt.u32.totalorder %s5953_s17, %s6968_s14 }
 0xd30   :  { %p5959_p7 = pnand %p5957_p6, %p5954_p5 }
 0xd32   :  { %5962 = shalt.err (!%p5959_p7)
}
 0xd33   :  { %4139 = dma.vmem_to_hbm [thread:$0]  %s4137_s13, 32, %s6968_s14, [#allocation3]  }
 0xd34   :  { %5963 = dma.done.wait [#allocation3], 32  }
 0xd35   :  { %5964 = vsyncadd [#allocation3], 4294967264 }
 0xd36   :  { %4143 = vsyncpa [#allocation3], 1 }

</bundles_post_ra>
